<compile_context>
chip_gen: v5e
topology: v5e:2x2
jax: 0.10.0
libtpu: 0.0.40
codegen_flags: <defaults>
</compile_context>

<pallas_src>
import functools

import jax
import jax.numpy as jnp
from jax import lax
from jax.experimental import pallas as pl
from jax.experimental.pallas import tpu as pltpu


# ---------------------------------------------------------------------------
# exact-style GELU (erf via Abramowitz & Stegun 7.1.26, |err| < 1.5e-7), same
# as PyTorch nn.GELU() (erf form) to f32 noise, built only from exp+polynomial.
# ---------------------------------------------------------------------------
def _erf(x):
    p = 0.3275911
    a1, a2, a3, a4, a5 = 0.254829592, -0.284496736, 1.421413741, -1.453152027, 1.061405429
    sign = jnp.where(x >= 0.0, 1.0, -1.0)
    z = jnp.abs(x)
    t = 1.0 / (1.0 + p * z)
    poly = ((((a5 * t + a4) * t + a3) * t + a2) * t + a1) * t
    return sign * (1.0 - poly * jnp.exp(-z * z))


def _gelu_exact(x):
    return 0.5 * x * (1.0 + _erf(x * 0.7071067811865476))


# ---------------------------------------------------------------------------
# Pallas kernel: the full layer stack.  grid = (B, depth); for each batch
# element the residual stream lives in the resident output block across depth.
# ---------------------------------------------------------------------------
def _selfattn_layer_kernel(x_ref, ln1g_ref, ln1b_ref, wqkv_ref, wo_ref, bo_ref,
                           ln2g_ref, ln2b_ref, w1_ref, b1_ref, w2_ref, b2_ref,
                           o_ref, *, heads, dim_head):
    eps = 1e-5
    bf16 = jnp.bfloat16
    inner = heads * dim_head
    layer = pl.program_id(1)

    # Seed the resident carry with the input tokens at the first layer.
    @pl.when(layer == 0)
    def _():
        o_ref[...] = x_ref[...]

    x = o_ref[...]                                          # (N, C) f32 residual stream

    # ---- LayerNorm 1 (f32) ----
    mu = jnp.mean(x, axis=-1, keepdims=True)
    var = jnp.mean((x - mu) ** 2, axis=-1, keepdims=True)
    h = (x - mu) * lax.rsqrt(var + eps) * ln1g_ref[...] + ln1b_ref[...]

    # ---- fused QKV projection: one lane-dense MXU matmul (softmax scale is
    #      already folded into the Q columns on the host) ----
    qkv = jnp.dot(h.astype(bf16), wqkv_ref[...],
                  preferred_element_type=jnp.float32)        # (N, 3*inner) f32

    # ---- per-head attention; out-projection accumulated head-by-head so every
    #      partial result stays C-wide (no concat, no k.T) ----
    acc = jnp.zeros(x.shape, jnp.float32)
    for hd in range(heads):                                  # static unrolled
        lo = hd * dim_head
        q = qkv[:, lo:lo + dim_head].astype(bf16)
        k = qkv[:, inner + lo:inner + lo + dim_head].astype(bf16)
        v = qkv[:, 2 * inner + lo:2 * inner + lo + dim_head].astype(bf16)
        s = lax.dot_general(q, k, (((1,), (1,)), ((), ())),
                            preferred_element_type=jnp.float32)      # (N, N)
        p = jax.nn.softmax(s, axis=-1)                                # f32
        oh = jnp.dot(p.astype(bf16), v,
                     preferred_element_type=jnp.float32)              # (N, dh)
        acc = acc + jnp.dot(oh.astype(bf16), wo_ref[lo:lo + dim_head, :],
                            preferred_element_type=jnp.float32)       # (N, C)
    x = x + acc + bo_ref[...]            # residual 1 (DropPath / Dropout = identity)

    # ---- LayerNorm 2 + MLP (GELU) ----
    mu2 = jnp.mean(x, axis=-1, keepdims=True)
    var2 = jnp.mean((x - mu2) ** 2, axis=-1, keepdims=True)
    h2 = (x - mu2) * lax.rsqrt(var2 + eps) * ln2g_ref[...] + ln2b_ref[...]
    m = jnp.dot(h2.astype(bf16), w1_ref[...],
                preferred_element_type=jnp.float32) + b1_ref[...]
    m = _gelu_exact(m)
    m = jnp.dot(m.astype(bf16), w2_ref[...],
                preferred_element_type=jnp.float32) + b2_ref[...]
    o_ref[...] = x + m                                       # residual 2


def basic_selfattn_layer(x, packed, *, heads, dim_head):
    """BasicSelfAttnLayer.forward(x, refer_x=None): all `depth` blocks in one call."""
    B, N, C = x.shape
    inner = heads * dim_head
    L = packed["wqkv"].shape[0]
    mlp_dim = packed["w1"].shape[-1]

    kernel = functools.partial(_selfattn_layer_kernel, heads=heads, dim_head=dim_head)

    x_spec = pl.BlockSpec((None, N, C), lambda b, l: (b, 0, 0))           # per-batch, resident over l
    vec_c = pl.BlockSpec((None, 1, C), lambda b, l: (l, 0, 0))            # per-layer (1, C) vectors
    vec_m = pl.BlockSpec((None, 1, mlp_dim), lambda b, l: (l, 0, 0))
    in_specs = [
        x_spec,
        vec_c, vec_c,                                                     # ln1 gamma/beta
        pl.BlockSpec((None, C, 3 * inner), lambda b, l: (l, 0, 0)),       # fused Wqkv (bf16)
        pl.BlockSpec((None, inner, C), lambda b, l: (l, 0, 0)),           # Wo (bf16)
        vec_c,                                                            # bo
        vec_c, vec_c,                                                     # ln2 gamma/beta
        pl.BlockSpec((None, C, mlp_dim), lambda b, l: (l, 0, 0)),         # W1 (bf16)
        vec_m,                                                            # b1
        pl.BlockSpec((None, mlp_dim, C), lambda b, l: (l, 0, 0)),         # W2 (bf16)
        vec_c,                                                            # b2
    ]
    out_spec = pl.BlockSpec((None, N, C), lambda b, l: (b, 0, 0))         # resident over l (carry)

    flops_per_step = (2 * N * C * 3 * inner            # QKV
                      + 4 * heads * N * N * dim_head   # scores + attn@V
                      + 2 * N * inner * C              # out projection
                      + 4 * N * C * mlp_dim)           # MLP
    cost = pl.CostEstimate(
        flops=int(B * L * flops_per_step),
        transcendentals=int(B * L * (heads * N * N + N * mlp_dim)),
        bytes_accessed=int(2 * B * N * C * 4
                           + sum(int(v.size) * v.dtype.itemsize for v in packed.values())),
    )

    return pl.pallas_call(
        kernel,
        out_shape=jax.ShapeDtypeStruct((B, N, C), x.dtype),
        grid=(B, L),
        in_specs=in_specs,
        out_specs=out_spec,
        compiler_params=pltpu.CompilerParams(
            dimension_semantics=("parallel", "arbitrary")),
        cost_estimate=cost,
    )(x, packed["ln1_g"], packed["ln1_b"], packed["wqkv"], packed["wo"],
      packed["bo"], packed["ln2_g"], packed["ln2_b"], packed["w1"],
      packed["b1"], packed["w2"], packed["b2"])


# ---------------------------------------------------------------------------
# host-side parameter construction / packing
# ---------------------------------------------------------------------------
def init_block_params(key, dim, heads, dim_head, mlp_dim):
    inner = heads * dim_head
    ks = jax.random.split(key, 9)

    def lin(k, fan_in, shape):
        bound = 1.0 / float(fan_in) ** 0.5
        return jax.random.uniform(k, shape, jnp.float32, -bound, bound)

    return dict(
        ln1_g=jnp.ones((dim,), jnp.float32),
        ln1_b=jnp.zeros((dim,), jnp.float32),
        wq=lin(ks[0], dim, (heads, dim, dim_head)),
        wk=lin(ks[1], dim, (heads, dim, dim_head)),
        wv=lin(ks[2], dim, (heads, dim, dim_head)),
        wo=lin(ks[3], inner, (inner, dim)),
        bo=lin(ks[4], inner, (dim,)),
        ln2_g=jnp.ones((dim,), jnp.float32),
        ln2_b=jnp.zeros((dim,), jnp.float32),
        w1=lin(ks[5], dim, (dim, mlp_dim)),
        b1=lin(ks[6], dim, (mlp_dim,)),
        w2=lin(ks[7], mlp_dim, (mlp_dim, dim)),
        b2=lin(ks[8], mlp_dim, (dim,)),
    )


def pack_params(blocks, heads, dim_head):
    """Stack per-layer params, fuse per-head QKV weights, fold the softmax scale
    into Wq, and cast the big matmul weights to bf16 (f32 accumulation on MXU)."""
    scale = dim_head ** -0.5
    C = blocks[0]["wq"].shape[1]

    def fuse_qkv(p):
        wq = jnp.transpose(p["wq"], (1, 0, 2)).reshape(C, -1) * scale   # scale folded
        wk = jnp.transpose(p["wk"], (1, 0, 2)).reshape(C, -1)
        wv = jnp.transpose(p["wv"], (1, 0, 2)).reshape(C, -1)
        return jnp.concatenate([wq, wk, wv], axis=-1)                    # (C, 3*inner)

    def stack(name):
        return jnp.stack([p[name] for p in blocks])

    return dict(
        ln1_g=stack("ln1_g")[:, None, :],
        ln1_b=stack("ln1_b")[:, None, :],
        wqkv=jnp.stack([fuse_qkv(p) for p in blocks]).astype(jnp.bfloat16),
        wo=stack("wo").astype(jnp.bfloat16),
        bo=stack("bo")[:, None, :],
        ln2_g=stack("ln2_g")[:, None, :],
        ln2_b=stack("ln2_b")[:, None, :],
        w1=stack("w1").astype(jnp.bfloat16),
        b1=stack("b1")[:, None, :],
        w2=stack("w2").astype(jnp.bfloat16),
        b2=stack("b2")[:, None, :],
    )


# ---------------------------------------------------------------------------
# references: (a) mixed-precision mirror of the kernel math, (b) full-f32
# PyTorch-semantics reference (per-head weights, explicit scale).
# ---------------------------------------------------------------------------
def _reference_mixed(x, packed, heads, dim_head):
    eps = 1e-5
    bf = jnp.bfloat16
    inner = heads * dim_head
    L = packed["wqkv"].shape[0]
    for l in range(L):
        mu = x.mean(-1, keepdims=True)
        var = ((x - mu) ** 2).mean(-1, keepdims=True)
        h = (x - mu) * lax.rsqrt(var + eps) * packed["ln1_g"][l] + packed["ln1_b"][l]
        qkv = jnp.dot(h.astype(bf), packed["wqkv"][l], preferred_element_type=jnp.float32)
        acc = jnp.zeros_like(x)
        for hd in range(heads):
            lo = hd * dim_head
            q = qkv[..., lo:lo + dim_head].astype(bf)
            k = qkv[..., inner + lo:inner + lo + dim_head].astype(bf)
            v = qkv[..., 2 * inner + lo:2 * inner + lo + dim_head].astype(bf)
            s = jnp.einsum("bnd,bmd->bnm", q, k, preferred_element_type=jnp.float32)
            p = jax.nn.softmax(s, axis=-1)
            oh = jnp.einsum("bnm,bmd->bnd", p.astype(bf), v,
                            preferred_element_type=jnp.float32)
            acc = acc + jnp.dot(oh.astype(bf), packed["wo"][l, lo:lo + dim_head, :],
                                preferred_element_type=jnp.float32)
        x = x + acc + packed["bo"][l]
        mu2 = x.mean(-1, keepdims=True)
        var2 = ((x - mu2) ** 2).mean(-1, keepdims=True)
        h2 = (x - mu2) * lax.rsqrt(var2 + eps) * packed["ln2_g"][l] + packed["ln2_b"][l]
        m = jnp.dot(h2.astype(bf), packed["w1"][l],
                    preferred_element_type=jnp.float32) + packed["b1"][l]
        m = _gelu_exact(m)
        m = jnp.dot(m.astype(bf), packed["w2"][l],
                    preferred_element_type=jnp.float32) + packed["b2"][l]
        x = x + m
    return x


def _block_reference_f32(x, p, heads, dim_head):
    eps = 1e-5
    scale = dim_head ** -0.5
    mu = x.mean(-1, keepdims=True)
    var = ((x - mu) ** 2).mean(-1, keepdims=True)
    h = (x - mu) / jnp.sqrt(var + eps) * p["ln1_g"] + p["ln1_b"]
    q = jnp.einsum("bnc,hcd->bhnd", h, p["wq"])
    k = jnp.einsum("bnc,hcd->bhnd", h, p["wk"])
    v = jnp.einsum("bnc,hcd->bhnd", h, p["wv"])
    attn = jax.nn.softmax(jnp.einsum("bhid,bhjd->bhij", q, k) * scale, axis=-1)
    out = jnp.einsum("bhij,bhjd->bhid", attn, v)
    out = out.transpose(0, 2, 1, 3).reshape(x.shape[0], x.shape[1], -1)
    x = x + out @ p["wo"] + p["bo"]
    mu2 = x.mean(-1, keepdims=True)
    var2 = ((x - mu2) ** 2).mean(-1, keepdims=True)
    h2 = (x - mu2) / jnp.sqrt(var2 + eps) * p["ln2_g"] + p["ln2_b"]
    m = _gelu_exact(h2 @ p["w1"] + p["b1"]) @ p["w2"] + p["b2"]
    return x + m


if __name__ == "__main__":
    # small, lane-aligned config consistent with the module (embed_dim multiple of 128)
    B, N = 2, 16
    dim, depth, heads, dim_head, mlp_ratio = 128, 2, 4, 32, 4.0
    mlp_dim = int(dim * mlp_ratio)

    key = jax.random.PRNGKey(0)
    kx, kp = jax.random.split(key)
    x = jax.random.normal(kx, (B, N, dim), jnp.float32)
    blocks = [init_block_params(k, dim, heads, dim_head, mlp_dim)
              for k in jax.random.split(kp, depth)]
    packed = pack_params(blocks, heads, dim_head)

    out = basic_selfattn_layer(x, packed, heads=heads, dim_head=dim_head)
    out = jax.block_until_ready(out)
    assert out.shape == (B, N, dim)

    # (a) mirror of the kernel's mixed-precision math — tight check
    ref_mixed = _reference_mixed(x, packed, heads, dim_head)
    err_mixed = float(jnp.max(jnp.abs(out - ref_mixed)))
    assert jnp.allclose(out, ref_mixed, atol=2e-3, rtol=2e-3), f"mixed max_err={err_mixed}"

    # (b) full-f32 PyTorch-semantics reference — loose sanity check (bf16 matmul inputs)
    ref_f32 = x
    for p in blocks:
        ref_f32 = _block_reference_f32(ref_f32, p, heads, dim_head)
    err_f32 = float(jnp.max(jnp.abs(out - ref_f32)))
    assert jnp.allclose(out, ref_f32, atol=5e-2, rtol=5e-2), f"f32 max_err={err_f32}"

    print("KERNEL_OK")
</pallas_src>

<mosaic_0001>
module attributes {stable_mosaic.version = 11 : i64} {
  func.func @_selfattn_layer_kernel(%arg0: i32, %arg1: i32, %arg2: memref<1x16x128xf32, #tpu.memory_space<vmem>>, %arg3: memref<1x1x128xf32, #tpu.memory_space<vmem>>, %arg4: memref<1x1x128xf32, #tpu.memory_space<vmem>>, %arg5: memref<1x128x384xbf16, #tpu.memory_space<vmem>>, %arg6: memref<1x128x128xbf16, #tpu.memory_space<vmem>>, %arg7: memref<1x1x128xf32, #tpu.memory_space<vmem>>, %arg8: memref<1x1x128xf32, #tpu.memory_space<vmem>>, %arg9: memref<1x1x128xf32, #tpu.memory_space<vmem>>, %arg10: memref<1x128x512xbf16, #tpu.memory_space<vmem>>, %arg11: memref<1x1x512xf32, #tpu.memory_space<vmem>>, %arg12: memref<1x512x128xbf16, #tpu.memory_space<vmem>>, %arg13: memref<1x1x128xf32, #tpu.memory_space<vmem>>, %arg14: memref<1x16x128xf32, #tpu.memory_space<vmem>>) attributes {dimension_semantics = [#tpu.dimension_semantics<parallel>, #tpu.dimension_semantics<arbitrary>], iteration_bounds = array<i64: 2, 2>, scalar_prefetch = 0 : i64, scratch_operands = 0 : i64, tpu.core_type = #tpu.core_type<tc>, window_params = [{transform_indices = @transform_0, window_bounds = array<i64: 1, 16, 128>}, {transform_indices = @transform_1, window_bounds = array<i64: 1, 1, 128>}, {transform_indices = @transform_2, window_bounds = array<i64: 1, 1, 128>}, {transform_indices = @transform_3, window_bounds = array<i64: 1, 128, 384>}, {transform_indices = @transform_4, window_bounds = array<i64: 1, 128, 128>}, {transform_indices = @transform_5, window_bounds = array<i64: 1, 1, 128>}, {transform_indices = @transform_6, window_bounds = array<i64: 1, 1, 128>}, {transform_indices = @transform_7, window_bounds = array<i64: 1, 1, 128>}, {transform_indices = @transform_8, window_bounds = array<i64: 1, 128, 512>}, {transform_indices = @transform_9, window_bounds = array<i64: 1, 1, 512>}, {transform_indices = @transform_10, window_bounds = array<i64: 1, 512, 128>}, {transform_indices = @transform_11, window_bounds = array<i64: 1, 1, 128>}, {transform_indices = @transform_12, window_bounds = array<i64: 1, 16, 128>}]} {
    %c0_i32 = arith.constant 0 : i32
    %0 = arith.cmpi eq, %arg1, %c0_i32 : i32
    %1 = arith.extui %0 : i1 to i32
    %c0_i32_0 = arith.constant 0 : i32
    %2 = arith.cmpi ne, %1, %c0_i32_0 : i32
    scf.if %2 {
      %c0_98 = arith.constant 0 : index
      %c0_99 = arith.constant 0 : index
      %c0_100 = arith.constant 0 : index
      %228 = vector.load %arg2[%c0_98, %c0_99, %c0_100] : memref<1x16x128xf32, #tpu.memory_space<vmem>>, vector<1x16x128xf32>
      %229 = vector.shape_cast %228 : vector<1x16x128xf32> to vector<16x128xf32>
      %c0_101 = arith.constant 0 : index
      %c0_102 = arith.constant 0 : index
      %c0_103 = arith.constant 0 : index
      %230 = vector.load %arg14[%c0_101, %c0_102, %c0_103] : memref<1x16x128xf32, #tpu.memory_space<vmem>>, vector<1x16x128xf32>
      %231 = vector.shape_cast %230 : vector<1x16x128xf32> to vector<16x128xf32>
      %232 = vector.shape_cast %229 : vector<16x128xf32> to vector<1x16x128xf32>
      tpu.vector_store %arg14[%c0_101, %c0_102, %c0_103], %232 {strides = array<i32>} : memref<1x16x128xf32, #tpu.memory_space<vmem>>, vector<1x16x128xf32>,
    } else {
    }
    %c0 = arith.constant 0 : index
    %c0_1 = arith.constant 0 : index
    %c0_2 = arith.constant 0 : index
    %3 = vector.load %arg14[%c0, %c0_1, %c0_2] : memref<1x16x128xf32, #tpu.memory_space<vmem>>, vector<1x16x128xf32>
    %4 = vector.shape_cast %3 : vector<1x16x128xf32> to vector<16x128xf32>
    %cst = arith.constant dense<0.000000e+00> : vector<16xf32>
    %5 = vector.multi_reduction <add>, %4, %cst [1] : vector<16x128xf32> to vector<16xf32>
    %6 = vector.shape_cast %5 : vector<16xf32> to vector<16x1xf32>
    %cst_3 = arith.constant 1.280000e+02 : f32
    %7 = vector.broadcast %cst_3 : f32 to vector<16x1xf32>
    %8 = arith.divf %6, %7 : vector<16x1xf32>
    %9 = vector.broadcast %8 : vector<16x1xf32> to vector<16x128xf32>
    %10 = arith.subf %4, %9 : vector<16x128xf32>
    %11 = arith.mulf %10, %10 : vector<16x128xf32>
    %cst_4 = arith.constant dense<0.000000e+00> : vector<16xf32>
    %12 = vector.multi_reduction <add>, %11, %cst_4 [1] : vector<16x128xf32> to vector<16xf32>
    %13 = vector.shape_cast %12 : vector<16xf32> to vector<16x1xf32>
    %cst_5 = arith.constant 1.280000e+02 : f32
    %14 = vector.broadcast %cst_5 : f32 to vector<16x1xf32>
    %15 = arith.divf %13, %14 : vector<16x1xf32>
    %16 = vector.broadcast %8 : vector<16x1xf32> to vector<16x128xf32>
    %17 = arith.subf %4, %16 : vector<16x128xf32>
    %cst_6 = arith.constant 9.99999974E-6 : f32
    %18 = vector.broadcast %cst_6 : f32 to vector<16x1xf32>
    %19 = arith.addf %15, %18 : vector<16x1xf32>
    %20 = math.rsqrt %19 : vector<16x1xf32>
    %21 = vector.broadcast %20 : vector<16x1xf32> to vector<16x128xf32>
    %22 = arith.mulf %17, %21 : vector<16x128xf32>
    %c0_7 = arith.constant 0 : index
    %c0_8 = arith.constant 0 : index
    %c0_9 = arith.constant 0 : index
    %23 = vector.load %arg3[%c0_7, %c0_8, %c0_9] : memref<1x1x128xf32, #tpu.memory_space<vmem>>, vector<1x1x128xf32>
    %24 = vector.shape_cast %23 : vector<1x1x128xf32> to vector<1x128xf32>
    %25 = vector.broadcast %24 : vector<1x128xf32> to vector<16x128xf32>
    %26 = arith.mulf %22, %25 : vector<16x128xf32>
    %c0_10 = arith.constant 0 : index
    %c0_11 = arith.constant 0 : index
    %c0_12 = arith.constant 0 : index
    %27 = vector.load %arg4[%c0_10, %c0_11, %c0_12] : memref<1x1x128xf32, #tpu.memory_space<vmem>>, vector<1x1x128xf32>
    %28 = vector.shape_cast %27 : vector<1x1x128xf32> to vector<1x128xf32>
    %29 = vector.broadcast %28 : vector<1x128xf32> to vector<16x128xf32>
    %30 = arith.addf %26, %29 : vector<16x128xf32>
    %31 = arith.truncf %30 : vector<16x128xf32> to vector<16x128xbf16>
    %c0_13 = arith.constant 0 : index
    %c0_14 = arith.constant 0 : index
    %c0_15 = arith.constant 0 : index
    %32 = vector.load %arg5[%c0_13, %c0_14, %c0_15] : memref<1x128x384xbf16, #tpu.memory_space<vmem>>, vector<1x128x384xbf16>
    %33 = vector.shape_cast %32 : vector<1x128x384xbf16> to vector<128x384xbf16>
    %cst_16 = arith.constant dense<0.000000e+00> : vector<16x384xf32>
    %34 = tpu.matmul %31, %33, %cst_16 {dimension_numbers = #tpu.dot_dimension_numbers<[1], [0], [0], [1], [0, 0, 1, 1], [], []>} : vector<16x128xbf16>, vector<128x384xbf16>, vector<16x384xf32> -> vector<16x384xf32>
    %cst_17 = arith.constant 0.000000e+00 : f32
    %35 = vector.broadcast %cst_17 : f32 to vector<16x128xf32>
    %36 = vector.extract_strided_slice %34 {offsets = [0, 0], sizes = [16, 32], strides = [1, 1]} : vector<16x384xf32> to vector<16x32xf32>
    %37 = arith.truncf %36 : vector<16x32xf32> to vector<16x32xbf16>
    %38 = vector.extract_strided_slice %34 {offsets = [0, 128], sizes = [16, 32], strides = [1, 1]} : vector<16x384xf32> to vector<16x32xf32>
    %39 = arith.truncf %38 : vector<16x32xf32> to vector<16x32xbf16>
    %40 = vector.extract_strided_slice %34 {offsets = [0, 256], sizes = [16, 32], strides = [1, 1]} : vector<16x384xf32> to vector<16x32xf32>
    %41 = arith.truncf %40 : vector<16x32xf32> to vector<16x32xbf16>
    %cst_18 = arith.constant dense<0.000000e+00> : vector<16x16xf32>
    %42 = tpu.matmul %37, %39, %cst_18 {dimension_numbers = #tpu.dot_dimension_numbers<[1], [1], [0], [0], [0, 0, 1, 0], [], []>} : vector<16x32xbf16>, vector<16x32xbf16>, vector<16x16xf32> -> vector<16x16xf32>
    %cst_19 = arith.constant dense<0xFF800000> : vector<16xf32>
    %43 = vector.multi_reduction <maximumf>, %42, %cst_19 [1] : vector<16x16xf32> to vector<16xf32>
    %cst_20 = arith.constant 0xFF800000 : f32
    %44 = vector.broadcast %cst_20 : f32 to vector<16xf32>
    %45 = arith.maximumf %44, %43 : vector<16xf32>
    %46 = vector.shape_cast %45 : vector<16xf32> to vector<16x1xf32>
    %47 = vector.broadcast %46 : vector<16x1xf32> to vector<16x16xf32>
    %48 = arith.subf %42, %47 : vector<16x16xf32>
    %49 = math.exp %48 : vector<16x16xf32>
    %cst_21 = arith.constant dense<0.000000e+00> : vector<16xf32>
    %50 = vector.multi_reduction <add>, %49, %cst_21 [1] : vector<16x16xf32> to vector<16xf32>
    %51 = vector.shape_cast %50 : vector<16xf32> to vector<16x1xf32>
    %52 = vector.broadcast %51 : vector<16x1xf32> to vector<16x16xf32>
    %53 = arith.divf %49, %52 : vector<16x16xf32>
    %54 = arith.truncf %53 : vector<16x16xf32> to vector<16x16xbf16>
    %cst_22 = arith.constant dense<0.000000e+00> : vector<16x32xf32>
    %55 = tpu.matmul %54, %41, %cst_22 {dimension_numbers = #tpu.dot_dimension_numbers<[1], [0], [0], [1], [0, 0, 1, 1], [], []>} : vector<16x16xbf16>, vector<16x32xbf16>, vector<16x32xf32> -> vector<16x32xf32>
    %56 = arith.truncf %55 : vector<16x32xf32> to vector<16x32xbf16>
    %c0_23 = arith.constant 0 : index
    %c0_24 = arith.constant 0 : index
    %c0_25 = arith.constant 0 : index
    %57 = vector.load %arg6[%c0_23, %c0_24, %c0_25] : memref<1x128x128xbf16, #tpu.memory_space<vmem>>, vector<1x32x128xbf16>
    %58 = vector.shape_cast %57 : vector<1x32x128xbf16> to vector<32x128xbf16>
    %cst_26 = arith.constant dense<0.000000e+00> : vector<16x128xf32>
    %59 = tpu.matmul %56, %58, %cst_26 {dimension_numbers = #tpu.dot_dimension_numbers<[1], [0], [0], [1], [0, 0, 1, 1], [], []>} : vector<16x32xbf16>, vector<32x128xbf16>, vector<16x128xf32> -> vector<16x128xf32>
    %60 = arith.addf %35, %59 : vector<16x128xf32>
    %61 = vector.extract_strided_slice %34 {offsets = [0, 32], sizes = [16, 32], strides = [1, 1]} : vector<16x384xf32> to vector<16x32xf32>
    %62 = arith.truncf %61 : vector<16x32xf32> to vector<16x32xbf16>
    %63 = vector.extract_strided_slice %34 {offsets = [0, 160], sizes = [16, 32], strides = [1, 1]} : vector<16x384xf32> to vector<16x32xf32>
    %64 = arith.truncf %63 : vector<16x32xf32> to vector<16x32xbf16>
    %65 = vector.extract_strided_slice %34 {offsets = [0, 288], sizes = [16, 32], strides = [1, 1]} : vector<16x384xf32> to vector<16x32xf32>
    %66 = arith.truncf %65 : vector<16x32xf32> to vector<16x32xbf16>
    %cst_27 = arith.constant dense<0.000000e+00> : vector<16x16xf32>
    %67 = tpu.matmul %62, %64, %cst_27 {dimension_numbers = #tpu.dot_dimension_numbers<[1], [1], [0], [0], [0, 0, 1, 0], [], []>} : vector<16x32xbf16>, vector<16x32xbf16>, vector<16x16xf32> -> vector<16x16xf32>
    %cst_28 = arith.constant dense<0xFF800000> : vector<16xf32>
    %68 = vector.multi_reduction <maximumf>, %67, %cst_28 [1] : vector<16x16xf32> to vector<16xf32>
    %cst_29 = arith.constant 0xFF800000 : f32
    %69 = vector.broadcast %cst_29 : f32 to vector<16xf32>
    %70 = arith.maximumf %69, %68 : vector<16xf32>
    %71 = vector.shape_cast %70 : vector<16xf32> to vector<16x1xf32>
    %72 = vector.broadcast %71 : vector<16x1xf32> to vector<16x16xf32>
    %73 = arith.subf %67, %72 : vector<16x16xf32>
    %74 = math.exp %73 : vector<16x16xf32>
    %cst_30 = arith.constant dense<0.000000e+00> : vector<16xf32>
    %75 = vector.multi_reduction <add>, %74, %cst_30 [1] : vector<16x16xf32> to vector<16xf32>
    %76 = vector.shape_cast %75 : vector<16xf32> to vector<16x1xf32>
    %77 = vector.broadcast %76 : vector<16x1xf32> to vector<16x16xf32>
    %78 = arith.divf %74, %77 : vector<16x16xf32>
    %79 = arith.truncf %78 : vector<16x16xf32> to vector<16x16xbf16>
    %cst_31 = arith.constant dense<0.000000e+00> : vector<16x32xf32>
    %80 = tpu.matmul %79, %66, %cst_31 {dimension_numbers = #tpu.dot_dimension_numbers<[1], [0], [0], [1], [0, 0, 1, 1], [], []>} : vector<16x16xbf16>, vector<16x32xbf16>, vector<16x32xf32> -> vector<16x32xf32>
    %81 = arith.truncf %80 : vector<16x32xf32> to vector<16x32xbf16>
    %c0_32 = arith.constant 0 : index
    %c32 = arith.constant 32 : index
    %c0_33 = arith.constant 0 : index
    %82 = vector.load %arg6[%c0_32, %c32, %c0_33] : memref<1x128x128xbf16, #tpu.memory_space<vmem>>, vector<1x32x128xbf16>
    %83 = vector.shape_cast %82 : vector<1x32x128xbf16> to vector<32x128xbf16>
    %cst_34 = arith.constant dense<0.000000e+00> : vector<16x128xf32>
    %84 = tpu.matmul %81, %83, %cst_34 {dimension_numbers = #tpu.dot_dimension_numbers<[1], [0], [0], [1], [0, 0, 1, 1], [], []>} : vector<16x32xbf16>, vector<32x128xbf16>, vector<16x128xf32> -> vector<16x128xf32>
    %85 = arith.addf %60, %84 : vector<16x128xf32>
    %86 = vector.extract_strided_slice %34 {offsets = [0, 64], sizes = [16, 32], strides = [1, 1]} : vector<16x384xf32> to vector<16x32xf32>
    %87 = arith.truncf %86 : vector<16x32xf32> to vector<16x32xbf16>
    %88 = vector.extract_strided_slice %34 {offsets = [0, 192], sizes = [16, 32], strides = [1, 1]} : vector<16x384xf32> to vector<16x32xf32>
    %89 = arith.truncf %88 : vector<16x32xf32> to vector<16x32xbf16>
    %90 = vector.extract_strided_slice %34 {offsets = [0, 320], sizes = [16, 32], strides = [1, 1]} : vector<16x384xf32> to vector<16x32xf32>
    %91 = arith.truncf %90 : vector<16x32xf32> to vector<16x32xbf16>
    %cst_35 = arith.constant dense<0.000000e+00> : vector<16x16xf32>
    %92 = tpu.matmul %87, %89, %cst_35 {dimension_numbers = #tpu.dot_dimension_numbers<[1], [1], [0], [0], [0, 0, 1, 0], [], []>} : vector<16x32xbf16>, vector<16x32xbf16>, vector<16x16xf32> -> vector<16x16xf32>
    %cst_36 = arith.constant dense<0xFF800000> : vector<16xf32>
    %93 = vector.multi_reduction <maximumf>, %92, %cst_36 [1] : vector<16x16xf32> to vector<16xf32>
    %cst_37 = arith.constant 0xFF800000 : f32
    %94 = vector.broadcast %cst_37 : f32 to vector<16xf32>
    %95 = arith.maximumf %94, %93 : vector<16xf32>
    %96 = vector.shape_cast %95 : vector<16xf32> to vector<16x1xf32>
    %97 = vector.broadcast %96 : vector<16x1xf32> to vector<16x16xf32>
    %98 = arith.subf %92, %97 : vector<16x16xf32>
    %99 = math.exp %98 : vector<16x16xf32>
    %cst_38 = arith.constant dense<0.000000e+00> : vector<16xf32>
    %100 = vector.multi_reduction <add>, %99, %cst_38 [1] : vector<16x16xf32> to vector<16xf32>
    %101 = vector.shape_cast %100 : vector<16xf32> to vector<16x1xf32>
    %102 = vector.broadcast %101 : vector<16x1xf32> to vector<16x16xf32>
    %103 = arith.divf %99, %102 : vector<16x16xf32>
    %104 = arith.truncf %103 : vector<16x16xf32> to vector<16x16xbf16>
    %cst_39 = arith.constant dense<0.000000e+00> : vector<16x32xf32>
    %105 = tpu.matmul %104, %91, %cst_39 {dimension_numbers = #tpu.dot_dimension_numbers<[1], [0], [0], [1], [0, 0, 1, 1], [], []>} : vector<16x16xbf16>, vector<16x32xbf16>, vector<16x32xf32> -> vector<16x32xf32>
    %106 = arith.truncf %105 : vector<16x32xf32> to vector<16x32xbf16>
    %c0_40 = arith.constant 0 : index
    %c64 = arith.constant 64 : index
    %c0_41 = arith.constant 0 : index
    %107 = vector.load %arg6[%c0_40, %c64, %c0_41] : memref<1x128x128xbf16, #tpu.memory_space<vmem>>, vector<1x32x128xbf16>
    %108 = vector.shape_cast %107 : vector<1x32x128xbf16> to vector<32x128xbf16>
    %cst_42 = arith.constant dense<0.000000e+00> : vector<16x128xf32>
    %109 = tpu.matmul %106, %108, %cst_42 {dimension_numbers = #tpu.dot_dimension_numbers<[1], [0], [0], [1], [0, 0, 1, 1], [], []>} : vector<16x32xbf16>, vector<32x128xbf16>, vector<16x128xf32> -> vector<16x128xf32>
    %110 = arith.addf %85, %109 : vector<16x128xf32>
    %111 = vector.extract_strided_slice %34 {offsets = [0, 96], sizes = [16, 32], strides = [1, 1]} : vector<16x384xf32> to vector<16x32xf32>
    %112 = arith.truncf %111 : vector<16x32xf32> to vector<16x32xbf16>
    %113 = vector.extract_strided_slice %34 {offsets = [0, 224], sizes = [16, 32], strides = [1, 1]} : vector<16x384xf32> to vector<16x32xf32>
    %114 = arith.truncf %113 : vector<16x32xf32> to vector<16x32xbf16>
    %115 = vector.extract_strided_slice %34 {offsets = [0, 352], sizes = [16, 32], strides = [1, 1]} : vector<16x384xf32> to vector<16x32xf32>
    %116 = arith.truncf %115 : vector<16x32xf32> to vector<16x32xbf16>
    %cst_43 = arith.constant dense<0.000000e+00> : vector<16x16xf32>
    %117 = tpu.matmul %112, %114, %cst_43 {dimension_numbers = #tpu.dot_dimension_numbers<[1], [1], [0], [0], [0, 0, 1, 0], [], []>} : vector<16x32xbf16>, vector<16x32xbf16>, vector<16x16xf32> -> vector<16x16xf32>
    %cst_44 = arith.constant dense<0xFF800000> : vector<16xf32>
    %118 = vector.multi_reduction <maximumf>, %117, %cst_44 [1] : vector<16x16xf32> to vector<16xf32>
    %cst_45 = arith.constant 0xFF800000 : f32
    %119 = vector.broadcast %cst_45 : f32 to vector<16xf32>
    %120 = arith.maximumf %119, %118 : vector<16xf32>
    %121 = vector.shape_cast %120 : vector<16xf32> to vector<16x1xf32>
    %122 = vector.broadcast %121 : vector<16x1xf32> to vector<16x16xf32>
    %123 = arith.subf %117, %122 : vector<16x16xf32>
    %124 = math.exp %123 : vector<16x16xf32>
    %cst_46 = arith.constant dense<0.000000e+00> : vector<16xf32>
    %125 = vector.multi_reduction <add>, %124, %cst_46 [1] : vector<16x16xf32> to vector<16xf32>
    %126 = vector.shape_cast %125 : vector<16xf32> to vector<16x1xf32>
    %127 = vector.broadcast %126 : vector<16x1xf32> to vector<16x16xf32>
    %128 = arith.divf %124, %127 : vector<16x16xf32>
    %129 = arith.truncf %128 : vector<16x16xf32> to vector<16x16xbf16>
    %cst_47 = arith.constant dense<0.000000e+00> : vector<16x32xf32>
    %130 = tpu.matmul %129, %116, %cst_47 {dimension_numbers = #tpu.dot_dimension_numbers<[1], [0], [0], [1], [0, 0, 1, 1], [], []>} : vector<16x16xbf16>, vector<16x32xbf16>, vector<16x32xf32> -> vector<16x32xf32>
    %131 = arith.truncf %130 : vector<16x32xf32> to vector<16x32xbf16>
    %c0_48 = arith.constant 0 : index
    %c96 = arith.constant 96 : index
    %c0_49 = arith.constant 0 : index
    %132 = vector.load %arg6[%c0_48, %c96, %c0_49] : memref<1x128x128xbf16, #tpu.memory_space<vmem>>, vector<1x32x128xbf16>
    %133 = vector.shape_cast %132 : vector<1x32x128xbf16> to vector<32x128xbf16>
    %cst_50 = arith.constant dense<0.000000e+00> : vector<16x128xf32>
    %134 = tpu.matmul %131, %133, %cst_50 {dimension_numbers = #tpu.dot_dimension_numbers<[1], [0], [0], [1], [0, 0, 1, 1], [], []>} : vector<16x32xbf16>, vector<32x128xbf16>, vector<16x128xf32> -> vector<16x128xf32>
    %135 = arith.addf %110, %134 : vector<16x128xf32>
    %136 = arith.addf %4, %135 : vector<16x128xf32>
    %c0_51 = arith.constant 0 : index
    %c0_52 = arith.constant 0 : index
    %c0_53 = arith.constant 0 : index
    %137 = vector.load %arg7[%c0_51, %c0_52, %c0_53] : memref<1x1x128xf32, #tpu.memory_space<vmem>>, vector<1x1x128xf32>
    %138 = vector.shape_cast %137 : vector<1x1x128xf32> to vector<1x128xf32>
    %139 = vector.broadcast %138 : vector<1x128xf32> to vector<16x128xf32>
    %140 = arith.addf %136, %139 : vector<16x128xf32>
    %cst_54 = arith.constant dense<0.000000e+00> : vector<16xf32>
    %141 = vector.multi_reduction <add>, %140, %cst_54 [1] : vector<16x128xf32> to vector<16xf32>
    %142 = vector.shape_cast %141 : vector<16xf32> to vector<16x1xf32>
    %cst_55 = arith.constant 1.280000e+02 : f32
    %143 = vector.broadcast %cst_55 : f32 to vector<16x1xf32>
    %144 = arith.divf %142, %143 : vector<16x1xf32>
    %145 = vector.broadcast %144 : vector<16x1xf32> to vector<16x128xf32>
    %146 = arith.subf %140, %145 : vector<16x128xf32>
    %147 = arith.mulf %146, %146 : vector<16x128xf32>
    %cst_56 = arith.constant dense<0.000000e+00> : vector<16xf32>
    %148 = vector.multi_reduction <add>, %147, %cst_56 [1] : vector<16x128xf32> to vector<16xf32>
    %149 = vector.shape_cast %148 : vector<16xf32> to vector<16x1xf32>
    %cst_57 = arith.constant 1.280000e+02 : f32
    %150 = vector.broadcast %cst_57 : f32 to vector<16x1xf32>
    %151 = arith.divf %149, %150 : vector<16x1xf32>
    %152 = vector.broadcast %144 : vector<16x1xf32> to vector<16x128xf32>
    %153 = arith.subf %140, %152 : vector<16x128xf32>
    %cst_58 = arith.constant 9.99999974E-6 : f32
    %154 = vector.broadcast %cst_58 : f32 to vector<16x1xf32>
    %155 = arith.addf %151, %154 : vector<16x1xf32>
    %156 = math.rsqrt %155 : vector<16x1xf32>
    %157 = vector.broadcast %156 : vector<16x1xf32> to vector<16x128xf32>
    %158 = arith.mulf %153, %157 : vector<16x128xf32>
    %c0_59 = arith.constant 0 : index
    %c0_60 = arith.constant 0 : index
    %c0_61 = arith.constant 0 : index
    %159 = vector.load %arg8[%c0_59, %c0_60, %c0_61] : memref<1x1x128xf32, #tpu.memory_space<vmem>>, vector<1x1x128xf32>
    %160 = vector.shape_cast %159 : vector<1x1x128xf32> to vector<1x128xf32>
    %161 = vector.broadcast %160 : vector<1x128xf32> to vector<16x128xf32>
    %162 = arith.mulf %158, %161 : vector<16x128xf32>
    %c0_62 = arith.constant 0 : index
    %c0_63 = arith.constant 0 : index
    %c0_64 = arith.constant 0 : index
    %163 = vector.load %arg9[%c0_62, %c0_63, %c0_64] : memref<1x1x128xf32, #tpu.memory_space<vmem>>, vector<1x1x128xf32>
    %164 = vector.shape_cast %163 : vector<1x1x128xf32> to vector<1x128xf32>
    %165 = vector.broadcast %164 : vector<1x128xf32> to vector<16x128xf32>
    %166 = arith.addf %162, %165 : vector<16x128xf32>
    %167 = arith.truncf %166 : vector<16x128xf32> to vector<16x128xbf16>
    %c0_65 = arith.constant 0 : index
    %c0_66 = arith.constant 0 : index
    %c0_67 = arith.constant 0 : index
    %168 = vector.load %arg10[%c0_65, %c0_66, %c0_67] : memref<1x128x512xbf16, #tpu.memory_space<vmem>>, vector<1x128x512xbf16>
    %169 = vector.shape_cast %168 : vector<1x128x512xbf16> to vector<128x512xbf16>
    %cst_68 = arith.constant dense<0.000000e+00> : vector<16x512xf32>
    %170 = tpu.matmul %167, %169, %cst_68 {dimension_numbers = #tpu.dot_dimension_numbers<[1], [0], [0], [1], [0, 0, 1, 1], [], []>} : vector<16x128xbf16>, vector<128x512xbf16>, vector<16x512xf32> -> vector<16x512xf32>
    %c0_69 = arith.constant 0 : index
    %c0_70 = arith.constant 0 : index
    %c0_71 = arith.constant 0 : index
    %171 = vector.load %arg11[%c0_69, %c0_70, %c0_71] : memref<1x1x512xf32, #tpu.memory_space<vmem>>, vector<1x1x512xf32>
    %172 = vector.shape_cast %171 : vector<1x1x512xf32> to vector<1x512xf32>
    %173 = vector.broadcast %172 : vector<1x512xf32> to vector<16x512xf32>
    %174 = arith.addf %170, %173 : vector<16x512xf32>
    %cst_72 = arith.constant 5.000000e-01 : f32
    %175 = vector.broadcast %cst_72 : f32 to vector<16x512xf32>
    %176 = arith.mulf %175, %174 : vector<16x512xf32>
    %cst_73 = arith.constant 0.707106769 : f32
    %177 = vector.broadcast %cst_73 : f32 to vector<16x512xf32>
    %178 = arith.mulf %174, %177 : vector<16x512xf32>
    %cst_74 = arith.constant 0.000000e+00 : f32
    %179 = vector.broadcast %cst_74 : f32 to vector<16x512xf32>
    %180 = arith.cmpf oge, %178, %179 : vector<16x512xf32>
    %cst_75 = arith.constant 1.000000e+00 : f32
    %cst_76 = arith.constant -1.000000e+00 : f32
    %181 = vector.broadcast %cst_75 : f32 to vector<16x512xf32>
    %182 = vector.broadcast %cst_76 : f32 to vector<16x512xf32>
    %183 = arith.select %180, %181, %182 : vector<16x512xi1>, vector<16x512xf32>
    %184 = math.absf %178 : vector<16x512xf32>
    %cst_77 = arith.constant 0.327591091 : f32
    %185 = vector.broadcast %cst_77 : f32 to vector<16x512xf32>
    %186 = arith.mulf %185, %184 : vector<16x512xf32>
    %cst_78 = arith.constant 1.000000e+00 : f32
    %187 = vector.broadcast %cst_78 : f32 to vector<16x512xf32>
    %188 = arith.addf %187, %186 : vector<16x512xf32>
    %cst_79 = arith.constant 1.000000e+00 : f32
    %189 = vector.broadcast %cst_79 : f32 to vector<16x512xf32>
    %190 = arith.divf %189, %188 : vector<16x512xf32>
    %cst_80 = arith.constant 1.06140542 : f32
    %191 = vector.broadcast %cst_80 : f32 to vector<16x512xf32>
    %192 = arith.mulf %191, %190 : vector<16x512xf32>
    %cst_81 = arith.constant -1.45315206 : f32
    %193 = vector.broadcast %cst_81 : f32 to vector<16x512xf32>
    %194 = arith.addf %192, %193 : vector<16x512xf32>
    %195 = arith.mulf %194, %190 : vector<16x512xf32>
    %cst_82 = arith.constant 1.42141378 : f32
    %196 = vector.broadcast %cst_82 : f32 to vector<16x512xf32>
    %197 = arith.addf %195, %196 : vector<16x512xf32>
    %198 = arith.mulf %197, %190 : vector<16x512xf32>
    %cst_83 = arith.constant -0.284496725 : f32
    %199 = vector.broadcast %cst_83 : f32 to vector<16x512xf32>
    %200 = arith.addf %198, %199 : vector<16x512xf32>
    %201 = arith.mulf %200, %190 : vector<16x512xf32>
    %cst_84 = arith.constant 0.254829586 : f32
    %202 = vector.broadcast %cst_84 : f32 to vector<16x512xf32>
    %203 = arith.addf %201, %202 : vector<16x512xf32>
    %204 = arith.mulf %203, %190 : vector<16x512xf32>
    %cst_85 = arith.constant 0.000000e+00 : f32
    %205 = vector.broadcast %cst_85 : f32 to vector<16x512xf32>
    %206 = arith.subf %205, %184 : vector<16x512xf32>
    %207 = arith.mulf %206, %184 : vector<16x512xf32>
    %208 = math.exp %207 : vector<16x512xf32>
    %209 = arith.mulf %204, %208 : vector<16x512xf32>
    %cst_86 = arith.constant 1.000000e+00 : f32
    %210 = vector.broadcast %cst_86 : f32 to vector<16x512xf32>
    %211 = arith.subf %210, %209 : vector<16x512xf32>
    %212 = arith.mulf %183, %211 : vector<16x512xf32>
    %cst_87 = arith.constant 1.000000e+00 : f32
    %213 = vector.broadcast %cst_87 : f32 to vector<16x512xf32>
    %214 = arith.addf %213, %212 : vector<16x512xf32>
    %215 = arith.mulf %176, %214 : vector<16x512xf32>
    %216 = arith.truncf %215 : vector<16x512xf32> to vector<16x512xbf16>
    %c0_88 = arith.constant 0 : index
    %c0_89 = arith.constant 0 : index
    %c0_90 = arith.constant 0 : index
    %217 = vector.load %arg12[%c0_88, %c0_89, %c0_90] : memref<1x512x128xbf16, #tpu.memory_space<vmem>>, vector<1x512x128xbf16>
    %218 = vector.shape_cast %217 : vector<1x512x128xbf16> to vector<512x128xbf16>
    %cst_91 = arith.constant dense<0.000000e+00> : vector<16x128xf32>
    %219 = tpu.matmul %216, %218, %cst_91 {dimension_numbers = #tpu.dot_dimension_numbers<[1], [0], [0], [1], [0, 0, 1, 1], [], []>} : vector<16x512xbf16>, vector<512x128xbf16>, vector<16x128xf32> -> vector<16x128xf32>
    %c0_92 = arith.constant 0 : index
    %c0_93 = arith.constant 0 : index
    %c0_94 = arith.constant 0 : index
    %220 = vector.load %arg13[%c0_92, %c0_93, %c0_94] : memref<1x1x128xf32, #tpu.memory_space<vmem>>, vector<1x1x128xf32>
    %221 = vector.shape_cast %220 : vector<1x1x128xf32> to vector<1x128xf32>
    %222 = vector.broadcast %221 : vector<1x128xf32> to vector<16x128xf32>
    %223 = arith.addf %219, %222 : vector<16x128xf32>
    %224 = arith.addf %140, %223 : vector<16x128xf32>
    %c0_95 = arith.constant 0 : index
    %c0_96 = arith.constant 0 : index
    %c0_97 = arith.constant 0 : index
    %225 = vector.load %arg14[%c0_95, %c0_96, %c0_97] : memref<1x16x128xf32, #tpu.memory_space<vmem>>, vector<1x16x128xf32>
    %226 = vector.shape_cast %225 : vector<1x16x128xf32> to vector<16x128xf32>
    %227 = vector.shape_cast %224 : vector<16x128xf32> to vector<1x16x128xf32>
    tpu.vector_store %arg14[%c0_95, %c0_96, %c0_97], %227 {strides = array<i32>} : memref<1x16x128xf32, #tpu.memory_space<vmem>>, vector<1x16x128xf32>,
    return
  }
  func.func @transform_0(%arg0: i32, %arg1: i32) -> (i32, i32, i32) {
    %c0_i32 = arith.constant 0 : i32
    %c0_i32_0 = arith.constant 0 : i32
    %c0_i32_1 = arith.constant 0 : i32
    return %arg0, %c0_i32, %c0_i32_0 : i32, i32, i32
  }
  func.func @transform_1(%arg0: i32, %arg1: i32) -> (i32, i32, i32) {
    %c0_i32 = arith.constant 0 : i32
    %c0_i32_0 = arith.constant 0 : i32
    %c0_i32_1 = arith.constant 0 : i32
    return %arg1, %c0_i32, %c0_i32_0 : i32, i32, i32
  }
  func.func @transform_2(%arg0: i32, %arg1: i32) -> (i32, i32, i32) {
    %c0_i32 = arith.constant 0 : i32
    %c0_i32_0 = arith.constant 0 : i32
    %c0_i32_1 = arith.constant 0 : i32
    return %arg1, %c0_i32, %c0_i32_0 : i32, i32, i32
  }
  func.func @transform_3(%arg0: i32, %arg1: i32) -> (i32, i32, i32) {
    %c0_i32 = arith.constant 0 : i32
    %c0_i32_0 = arith.constant 0 : i32
    %c0_i32_1 = arith.constant 0 : i32
    return %arg1, %c0_i32, %c0_i32_0 : i32, i32, i32
  }
  func.func @transform_4(%arg0: i32, %arg1: i32) -> (i32, i32, i32) {
    %c0_i32 = arith.constant 0 : i32
    %c0_i32_0 = arith.constant 0 : i32
    %c0_i32_1 = arith.constant 0 : i32
    return %arg1, %c0_i32, %c0_i32_0 : i32, i32, i32
  }
  func.func @transform_5(%arg0: i32, %arg1: i32) -> (i32, i32, i32) {
    %c0_i32 = arith.constant 0 : i32
    %c0_i32_0 = arith.constant 0 : i32
    %c0_i32_1 = arith.constant 0 : i32
    return %arg1, %c0_i32, %c0_i32_0 : i32, i32, i32
  }
  func.func @transform_6(%arg0: i32, %arg1: i32) -> (i32, i32, i32) {
    %c0_i32 = arith.constant 0 : i32
    %c0_i32_0 = arith.constant 0 : i32
    %c0_i32_1 = arith.constant 0 : i32
    return %arg1, %c0_i32, %c0_i32_0 : i32, i32, i32
  }
  func.func @transform_7(%arg0: i32, %arg1: i32) -> (i32, i32, i32) {
    %c0_i32 = arith.constant 0 : i32
    %c0_i32_0 = arith.constant 0 : i32
    %c0_i32_1 = arith.constant 0 : i32
    return %arg1, %c0_i32, %c0_i32_0 : i32, i32, i32
  }
  func.func @transform_8(%arg0: i32, %arg1: i32) -> (i32, i32, i32) {
    %c0_i32 = arith.constant 0 : i32
    %c0_i32_0 = arith.constant 0 : i32
    %c0_i32_1 = arith.constant 0 : i32
    return %arg1, %c0_i32, %c0_i32_0 : i32, i32, i32
  }
  func.func @transform_9(%arg0: i32, %arg1: i32) -> (i32, i32, i32) {
    %c0_i32 = arith.constant 0 : i32
    %c0_i32_0 = arith.constant 0 : i32
    %c0_i32_1 = arith.constant 0 : i32
    return %arg1, %c0_i32, %c0_i32_0 : i32, i32, i32
  }
  func.func @transform_10(%arg0: i32, %arg1: i32) -> (i32, i32, i32) {
    %c0_i32 = arith.constant 0 : i32
    %c0_i32_0 = arith.constant 0 : i32
    %c0_i32_1 = arith.constant 0 : i32
    return %arg1, %c0_i32, %c0_i32_0 : i32, i32, i32
  }
  func.func @transform_11(%arg0: i32, %arg1: i32) -> (i32, i32, i32) {
    %c0_i32 = arith.constant 0 : i32
    %c0_i32_0 = arith.constant 0 : i32
    %c0_i32_1 = arith.constant 0 : i32
    return %arg1, %c0_i32, %c0_i32_0 : i32, i32, i32
  }
  func.func @transform_12(%arg0: i32, %arg1: i32) -> (i32, i32, i32) {
    %c0_i32 = arith.constant 0 : i32
    %c0_i32_0 = arith.constant 0 : i32
    %c0_i32_1 = arith.constant 0 : i32
    return %arg0, %c0_i32, %c0_i32_0 : i32, i32, i32
  }
}

</mosaic_0001>

<bundles_post_ra>
// kernel: tpu_custom_call.1
= control target key start
LH: loop header
LB: loop body
LE: loop exit
PB: predicated region body
PF: predicated region fallthrough
CT: control target
= control target key end

     0   :  { %s5162_s0 = inlined_call_operand.hbm [shape: f32[2,16,128], index: 0, kind: input, shape index: {}]   ;;  %s5163_s1 = inlined_call_operand.hbm [shape: f32[2,1,128], index: 1, kind: input, shape index: {}]   ;;  %s5164_s2 = inlined_call_operand.hbm [shape: f32[2,1,128], index: 2, kind: input, shape index: {}]   ;;  %s5165_s3 = inlined_call_operand.hbm [shape: bf16[2,128,384], index: 3, kind: input, shape index: {}]   ;;  %s5166_s4 = inlined_call_operand.hbm [shape: bf16[2,128,128], index: 4, kind: input, shape index: {}]   ;;  %s5167_s5 = inlined_call_operand.hbm [shape: f32[2,1,128], index: 5, kind: input, shape index: {}]   ;;  %s5168_s6 = inlined_call_operand.hbm [shape: f32[2,1,128], index: 6, kind: input, shape index: {}]   ;;  %s5169_s7 = inlined_call_operand.hbm [shape: f32[2,1,128], index: 7, kind: input, shape index: {}]   ;;  %s5170_s8 = inlined_call_operand.hbm [shape: bf16[2,128,512], index: 8, kind: input, shape index: {}]   ;;  %s5171_s9 = inlined_call_operand.vmem [shape: f32[2,1,512], index: 9, kind: input, shape index: {}]   ;;  %s5172_s10 = inlined_call_operand.hbm [shape: bf16[2,512,128], index: 10, kind: input, shape index: {}]   ;;  %s5173_s11 = inlined_call_operand.vmem [shape: f32[2,1,128], index: 11, kind: input, shape index: {}]   ;;  %s5174_s12 = inlined_call_operand.hbm [shape: f32[2,16,128], index: 12, kind: output, shape index: {}]  }
   0x1   :  { %5191 = sst [smem:[#allocation38_spill]] %s5162_s0 }
   0x2   :  { %5192 = sst [smem:[#allocation39_spill]] %s5163_s1 }
   0x3   :  { %5193 = sst [smem:[#allocation40_spill]] %s5164_s2 }
   0x4   :  { %5194 = sst [smem:[#allocation41_spill]] %s5165_s3 }
   0x5   :  { %5195 = sst [smem:[#allocation42_spill]] %s5166_s4 }
   0x6   :  { %5196 = sst [smem:[#allocation43_spill]] %s5167_s5 }
   0x7   :  { %5197 = sst [smem:[#allocation44_spill]] %s5169_s7 }
   0x8   :  { %5198 = sst [smem:[#allocation45_spill]] %s5170_s8 }
   0x9   :  { %5199 = sst [smem:[#allocation46_spill]] %s5171_s9 }
   0xa   :  { %5200 = sst [smem:[#allocation47_spill]] %s5172_s10 }
   0xb   :  { %5201 = sst [smem:[#allocation48_spill]] %s5173_s11 }
   0xc   :  { %5202 = sst [smem:[#allocation49_spill]] %s5174_s12 }
   0xd   :  { %17 = vsyncpa [#allocation3], 0 }
   0xe   :  { %19 = vsyncpa [#allocation3 + $0x1], 0 }
   0xf   :  { %20 = vsyncpa [#allocation6], 0 }
  0x10   :  { %22 = vsyncpa [#allocation6 + $0x1], 0 }
  0x11   :  { %23 = vsyncpa [#allocation9], 0 }
  0x12   :  { %25 = vsyncpa [#allocation9 + $0x1], 0 }
  0x13   :  { %26 = vsyncpa [#allocation12], 0 }
  0x14   :  { %28 = vsyncpa [#allocation12 + $0x1], 0 }
  0x15   :  { %29 = vsyncpa [#allocation15], 0 }
  0x16   :  { %31 = vsyncpa [#allocation15 + $0x1], 0 }
  0x17   :  { %32 = vsyncpa [#allocation18], 0 }
  0x18   :  { %34 = vsyncpa [#allocation18 + $0x1], 0 }
  0x19   :  { %35 = vsyncpa [#allocation4], 0 }
  0x1a   :  { %37 = vsyncpa [#allocation4 + $0x1], 0  ;;  %s4149_s21 = smov 0   ;;  %s4151_s22 = smov 0  }
  0x1b   :  { %s4153_s23 = smov 0   ;;  %s4155_s24 = smov 0  }
  0x1c   :  { %s4157_s25 = smov 0   ;;  %s4159_s26 = smov 0  }
  0x1d   :  { %s4161_s27 = smov 0   ;;  %s4163_s28 = smov 0  }
  0x1e   :  { %s4165_s29 = smov 0   ;;  %s4167_s30 = smov 0  }
  0x1f   :  { %s4169_s13 = smov 0  }
  0x20 LB: > { %5203 = sst [smem:[#allocation27_spill]] %s4035_s23  ;;  %p70_p0 = scmp.eq.s32.totalorder %s4067_s13, 0  ;;  %s4067_s13 = sphi %s4169_s13, %s43_s13   ;;  %s4063_s30 = sphi %s4167_s30, %s5264_s30   ;;  %s4059_s29 = sphi %s4165_s29, %s5270_s29   ;;  %s4055_s28 = sphi %s4163_s28, %s5262_s28   ;;  %s4051_s27 = sphi %s4161_s27, %s5269_s27   ;;  %s4047_s26 = sphi %s4159_s26, %s5261_s26   ;;  %s4043_s25 = sphi %s4157_s25, %s5268_s25   ;;  %s4039_s24 = sphi %s4155_s24, %s5267_s24   ;;  %s4035_s23 = sphi %s4153_s23, %s5259_s23   ;;  %s4031_s22 = sphi %s4151_s22, %s5266_s22   ;;  %s4027_s21 = sphi %s4149_s21, %s5265_s21  }
  0x21   : > { %5204 = sst [smem:[#allocation28_spill]] %s4047_s26  ;;  %p95_p1 = scmp.ne.s32.totalorder %s4035_s23, %s4031_s22 }
  0x22   : > { %5205 = sst [smem:[#allocation29_spill]] %s4051_s27  ;;  %p5182_p2 = scmp.lt.s32.totalorder %s4067_s13, 4 }
  0x23   : > { %5206 = sst [smem:[#allocation30_spill]] %s4055_s28  ;;  %s4210_s15 = sand.u32 1, %s4067_s13  }
  0x24   : > { %5207 = sst [smem:[#allocation31_spill]] %s4063_s30  ;;  %p97_p3 = por %p95_p1, %p70_p0 }
  0x25   : > { %s4215_s16 = sand.u32 1, %s4035_s23   ;;  %s5208_s1 = sld [smem:[#allocation39_spill]] }
  0x26   : > { %s436_s14 = scalar_lea.vmem [#allocation5], %s4215_s16  ;;  %p4224_p4 = pnand %p5182_p2, %p97_p3 }
  0x27   : > { %s443_s12 = sshll.u32 %s436_s14, 4  ;;  %p2870_p5 = scmp.ge.s32.totalorder %s4067_s13, 1  ;;  %s444_s12 = int_to_ptr.vmem [resolvable:$true] %s443_s12 }
  0x28   : > { %p617_p6 = scmp.lt.s32.totalorder %s4067_s13, 5  ;;  %s5177_s17 = scalar_lea.sflag [#allocation6], %s4210_s15 }
  0x29   : > { %s3380_s18 = smul.u32 192, %s4215_s16  ;;  %s5212_s3 = sld [smem:[#allocation41_spill]] }
  0x2a   : > { %p4235_p7 = pnand %p2870_p5, %p617_p6  ;;  %s5213_s5 = sld [smem:[#allocation43_spill]] }
  0x2b   : > { %s439_s19 = scalar_lea.hbm %s5208_s1, %s4059_s29  ;;  %s471_s27 = scalar_lea.vmem [#allocation8], %s3380_s18 }
  0x2c   : > { %s441_s20 = sshll.u32 %s439_s19, 4  ;;  %s3381_s19 = smul.u32 192, %s4059_s29  ;;  %s442_s20 = int_to_ptr.hbm [resolvable:$true] %s441_s20 }
  0x2d   : > { %3411 = dma.hbm_to_vmem [thread:$0]  (!%p4224_p4), %s442_s20, 16, %s444_s12, %s5177_s17  }
  0x2e   : > { %s5210_s14 = scalar_select %p4235_p7, 1, 0 }
  0x2f   : > { %s476_s11 = scalar_lea.hbm %s5212_s3, %s3381_s19  ;;  %s479_s10 = sshll.u32 %s471_s27, 4  ;;  %s480_s10 = int_to_ptr.vmem [resolvable:$true] %s479_s10 }
  0x30   : > { %5211 = sst [smem:[#allocation32_spill]] %s5210_s14  ;;  %s477_s8 = sshll.u32 %s476_s11, 4  ;;  %s478_s8 = int_to_ptr.hbm [resolvable:$true] %s477_s8 }
  0x31   : > { %s5181_s12 = scalar_lea.sflag [#allocation9], %s4210_s15  ;;  %s4069_s20 = smov 192  }
  0x32   : > { %s4070_s17 = smov 12   ;;  %s517_s9 = scalar_lea.hbm %s5213_s5, %s4059_s29 }
  0x33   : > { %3417 = dma.hbm_to_vmem [thread:$0]  (!%p4224_p4), %s478_s8, 3072, %s480_s10, %s5181_s12, %s4069_s20, %s4069_s20, %s4070_s17  }
  0x34   : > { %s519_s27 = sshll.u32 %s517_s9, 4  ;;  %s514_s11 = scalar_lea.vmem [#allocation11], %s4215_s16  ;;  %s520_s27 = int_to_ptr.hbm [resolvable:$true] %s519_s27 }
  0x35   : > { %s521_s18 = sshll.u32 %s514_s11, 4  ;;  %s5180_s19 = scalar_lea.sflag [#allocation12], %s4210_s15  ;;  %s522_s18 = int_to_ptr.vmem [resolvable:$true] %s521_s18 }
  0x36   : > { %3423 = dma.hbm_to_vmem [thread:$0]  (!%p4224_p4), %s520_s27, 16, %s522_s18, %s5180_s19  }
  0x37   : > { %s5214_s7 = sld [smem:[#allocation44_spill]]  ;;  %s548_s14 = scalar_lea.vmem [#allocation14], %s4215_s16 }
  0x38   : > { %s555_s20 = sshll.u32 %s548_s14, 4  ;;  %s5179_s9 = scalar_lea.sflag [#allocation15], %s4210_s15  ;;  %s556_s20 = int_to_ptr.vmem [resolvable:$true] %s555_s20 }
  0x39   : > { %s4270_s27 = sadd.s32 4294967295, %s4067_s13   ;;  %s2854_s11 = sadd.s32 4294967294, %s4067_s13  }
  0x3a   : > { %s52_s18 = sadd.s32 1, %s4059_s29  ;;  %s55_s8 = sadd.s32 1, %s4063_s30 }
  0x3b   : > { %p53_p8 = scmp.ge.s32.totalorder %s52_s18, 2  ;;  %s62_s10 = sadd.s32 1, %s4047_s26 }
  0x3c   : > { %p69_p9 = scmp.ne.s32.totalorder %s4047_s26, %s4043_s25  ;;  %p75_p11 = scmp.ne.s32.totalorder %s4043_s25, %s4039_s24 }
  0x3d   : > { %s551_s17 = scalar_lea.hbm %s5214_s7, %s4059_s29  ;;  %s5272_s18 = smov (%p53_p8, %s52_s18), 0 }
  0x3e   : > { %s553_s1 = sshll.u32 %s551_s17, 4  ;;  %5215 = sst [smem:[#allocation33_spill]] %s5272_s18  ;;  %s554_s1 = int_to_ptr.hbm [resolvable:$true] %s553_s1 }
  0x3f   : > { %3429 = dma.hbm_to_vmem [thread:$0]  (!%p4224_p4), %s554_s1, 16, %s556_s20, %s5179_s9  }
  0x40   : > { %s5274_s8 = smov (!%p53_p8, %s55_s8), %s4063_s30  ;;  %p4286_p10 = por %p70_p0, %p69_p9 }
  0x41   : > { %p57_p12 = scmp.ge.s32.totalorder %s5274_s8, 2  ;;  %p76_p13 = scmp.eq.s32.totalorder %s4270_s27, 0 }
  0x42   : > { %s85_s14 = ssub.s32 %s4059_s29, %s5272_s18  ;;  %p101_p1 = scmp.ne.s32.totalorder %s4031_s22, %s4027_s21 }
  0x43   : > { %s5276_s8 = smov (%p57_p12, %s5274_s8), 0  ;;  %p4302_p3 = por %p76_p13, %p75_p11 }
  0x44   : > { %5217 = sst [smem:[#allocation34_spill]] %s5276_s8  ;;  %p86_p0 = scmp.eq.s32.totalorder %s85_s14, 0 }
  0x45   : > { %s59_s1 = ssub.s32 %s4063_s30, %s5276_s8  ;;  %p4308_p5 = por %p101_p1, %p76_p13 }
  0x46   : > { %p60_p6 = scmp.eq.s32.totalorder %s59_s1, 0  ;;  %p385_p8 = scmp.eq.s32.totalorder %s4270_s27, 3 }
  0x47   : > { %s5220_s19 = sadd.s32 1, %s4035_s23  ;;  %p391_p2 = scmp.eq.s32.totalorder %s2854_s11, 3 }
  0x48   : > { %s4316_s21 = scalar_select %p86_p0, %s4035_s23, %s5220_s19  }
  0x49   : > { %s4319_s12 = scalar_select %p60_p6, %s4047_s26, %s62_s10  }
  0x4a   : > { %5221 = sst [smem:[#allocation35_spill]] %s4316_s21  ;;  %p4324_p12 = por %p385_p8, %p69_p9 }
  0x4b   : > { %5222 = sst [smem:[#allocation36_spill]] %s4319_s12  ;;  %s411_s14 = sand.u32 1, %s4047_s26  }
  0x4c   : > { %s3279_s5 = sshll.u32 %s4063_s30, 4  ;;  %p4333_p13 = por %p391_p2, %p75_p11 }
  0x4d   : > { %s2857_s7 = sshll.u32 %s411_s14, 4  ;;  %s5226_s0 = sld [smem:[#allocation38_spill]] }
  0x4e   : > { %s5224_s1 = scalar_select %p4333_p13, 1, 0 }
  0x4f   : > { %s415_s11 = scalar_lea.vmem [#allocation2], %s2857_s7  ;;  %p5227_p9 = scmp.lt.s32.totalorder %s4067_s13, 4 }
  0x50   : > { %5225 = sst [smem:[#allocation37_spill]] %s5224_s1  ;;  %s423_s12 = sshll.u32 %s415_s11, 4  ;;  %s424_s12 = int_to_ptr.vmem [resolvable:$true] %s423_s12 }
  0x51   : > { %p3406_p2 = pnand %p5227_p9, %p4286_p10  ;;  %s412_s30 = scalar_lea.sflag [#allocation3], %s411_s14 }
  0x52   : > { %s4071_s26 = smov 128   ;;  %s4072_s21 = smov 8  }
  0x53   : > { %s420_s10 = scalar_lea.hbm %s5226_s0, %s3279_s5  ;;  %s5228_s2 = sld [smem:[#allocation40_spill]] }
  0x54   : > { %s421_s18 = sshll.u32 %s420_s10, 4  ;;  %s453_s8 = scalar_lea.vmem [#allocation7], %s4215_s16  ;;  %s422_s18 = int_to_ptr.hbm [resolvable:$true] %s421_s18 }
  0x55   : > { %3408 = dma.hbm_to_vmem [thread:$0]  (!%p3406_p2), %s422_s18, 256, %s424_s12, %s412_s30, %s4071_s26, %s4071_s26, %s4072_s21  }
  0x56   : > { %s460_s19 = sshll.u32 %s453_s8, 4  ;;  %s2861_s17 = sshll.u32 %s4215_s16, 6  ;;  %s461_s19 = int_to_ptr.vmem [resolvable:$true] %s460_s19 }
  0x57   : > { %s5229_s10 = scalar_lea.sflag [#allocation6], %s4210_s15  ;;  %s3280_s14 = sshll.u32 %s4059_s29, 6 }
  0x58   : > { %s5230_s4 = sld [smem:[#allocation42_spill]]  ;;  %s493_s30 = scalar_lea.vmem [#allocation10], %s2861_s17 }
  0x59   : > { %s456_s5 = scalar_lea.hbm %s5228_s2, %s4059_s29  ;;  %s501_s12 = sshll.u32 %s493_s30, 4  ;;  %s502_s12 = int_to_ptr.vmem [resolvable:$true] %s501_s12 }
  0x5a   : > { %s458_s7 = sshll.u32 %s456_s5, 4  ;;  %s5189_s21 = smov 64   ;;  %s459_s7 = int_to_ptr.hbm [resolvable:$true] %s458_s7 }
  0x5b   : > { %3414 = dma.hbm_to_vmem [thread:$0]  (!%p4224_p4), %s459_s7, 16, %s461_s19, %s5229_s10  }
  0x5c   : > { %s5190_s1 = smov 4   ;;  %s5231_s5 = scalar_lea.sflag [#allocation9], %s4210_s15 }
  0x5d   : > { %s534_s7 = scalar_lea.hbm %s5168_s6, %s4059_s29  ;;  %s531_s10 = scalar_lea.vmem [#allocation13], %s4215_s16 }
  0x5e   : > { %s498_s23 = scalar_lea.hbm %s5230_s4, %s3280_s14  ;;  %s538_s17 = sshll.u32 %s531_s10, 4  ;;  %s539_s17 = int_to_ptr.vmem [resolvable:$true] %s538_s17 }
  0x5f   : > { %s499_s18 = sshll.u32 %s498_s23, 4  ;;  %s536_s14 = sshll.u32 %s534_s7, 4  ;;  %s500_s18 = int_to_ptr.hbm [resolvable:$true] %s499_s18  ;;  %s537_s14 = int_to_ptr.hbm [resolvable:$true] %s536_s14 }
  0x60   : > { %3420 = dma.hbm_to_vmem [thread:$0]  (!%p4224_p4), %s500_s18, 1024, %s502_s12, %s5231_s5, %s5189_s21, %s5189_s21, %s5190_s1  }
  0x61   : > { %s2864_s11 = sshll.u32 %s4215_s16, 8  ;;  %s5232_s26 = scalar_lea.sflag [#allocation12], %s4210_s15 }
  0x62   : > { %3426 = dma.hbm_to_vmem [thread:$0]  (!%p4224_p4), %s537_s14, 16, %s539_s17, %s5232_s26  }
  0x63   : > { %s3281_s23 = sshll.u32 %s4059_s29, 8  ;;  %s5233_s2 = sld [smem:[#allocation45_spill]] }
  0x64   : > { %s566_s18 = scalar_lea.vmem [#allocation16], %s2864_s11  ;;  %s4075_s19 = smov 256  }
  0x65   : > { %s574_s5 = sshll.u32 %s566_s18, 4  ;;  %s4076_s7 = smov 16   ;;  %s575_s5 = int_to_ptr.vmem [resolvable:$true] %s574_s5 }
  0x66   : > { %s5234_s10 = scalar_lea.sflag [#allocation15], %s4210_s15  ;;  %s5235_s17 = sld [smem:[#allocation47_spill]] }
  0x67   : > { %s595_s4 = scalar_lea.vmem [#allocation17], %s2864_s11  ;;  %s5236_s30 = smov 4  }
  0x68   : > { %s603_s0 = sshll.u32 %s595_s4, 4  ;;  %s4395_s15 = sand.u32 (!%p4235_p7), 1, %s4043_s25   ;;  %s604_s0 = int_to_ptr.vmem [resolvable:$true] %s603_s0 }
  0x69   : > { %s571_s12 = scalar_lea.hbm %s5233_s2, %s3281_s23  ;;  %s592_s2 = scalar_lea.sflag [#allocation18], %s4215_s16 }
  0x6a   : > { %s572_s8 = sshll.u32 %s571_s12, 4  ;;  %s5237_s12 = smov 64   ;;  %s573_s8 = int_to_ptr.hbm [resolvable:$true] %s572_s8 }
  0x6b   : > { %3432 = dma.hbm_to_vmem [thread:$0]  (!%p4224_p4), %s573_s8, 4096, %s575_s5, %s5234_s10, %s4075_s19, %s4075_s19, %s4076_s7  }
  0x6c   : > { %s600_s14 = scalar_lea.hbm %s5235_s17, %s3281_s23  ;;  %621 = sbr.rel (%p4235_p7) target bundleno = 2490 (0x9ba), region = 68 }
  0x6d   : > { %s601_s26 = sshll.u32 %s600_s14, 4  ;;  %s2871_s21 = sshll.u32 (!%p4235_p7), %s4395_s15, 4  ;;  %s602_s26 = int_to_ptr.hbm [resolvable:$true] %s601_s26 }
  0x6e   : > { %3435 = dma.hbm_to_vmem [thread:$0]  (!%p4224_p4), %s602_s26, 4096, %s604_s0, %s592_s2, %s5237_s12, %s5237_s12, %s5236_s30  }
  0x6f   : > { %s624_s4 = scalar_lea.sflag (!%p4235_p7), [#allocation3], %s4395_s15  ;;  %s4401_s1 = scalar_lea.vmem (!%p4235_p7), [#allocation2], %s2871_s21 }
  0x71   : > { %3998 = dma.done.wait (%p4302_p3), %s624_s4, 256  }
  0x72   : > { %4000 = vsyncadd (%p4302_p3), %s624_s4, 4294967040  ;;  %s633_s28 = sand.u32 1, %s4270_s27   ;;  %s4409_s16 = sand.u32 1, %s4031_s22  }
  0x73   : > { %s634_s11 = scalar_lea.sflag [#allocation6], %s633_s28  ;;  %s636_s23 = scalar_lea.vmem [#allocation5], %s4409_s16 }
  0x74   : > { %4002 = dma.done.wait (%p4308_p5), %s634_s11, 32  }
  0x75   : > { %4004 = vsyncadd (%p4308_p5), %s634_s11, 4294967264  ;;  %s3382_s5 = smul.u32 192, %s4409_s16  ;;  %s645_s20 = scalar_lea.vmem [#allocation7], %s4409_s16 }
  0x76   : > { %s652_s8 = scalar_lea.sflag [#allocation9], %s633_s28 }
  0x77   : > { %s4418_s19 = scalar_lea.vmem [#allocation8], %s3382_s5 }
  0x78   : > { %4006 = dma.done.wait (%p4308_p5), %s652_s8, 4096  }
  0x79   : > { %4008 = vsyncadd (%p4308_p5), %s652_s8, 4294963200  ;;  %s2872_s27 = sshll.u32 %s4409_s16, 6  ;;  %s672_s10 = scalar_lea.sflag [#allocation12], %s633_s28 }
  0x7a   : > { %s4425_s7 = scalar_lea.vmem [#allocation10], %s2872_s27  ;;  %s674_s17 = scalar_lea.vmem [#allocation11], %s4409_s16 }
  0x7b   : > { %4010 = dma.done.wait (%p4308_p5), %s672_s10, 32  }
  0x7c   : > { %4012 = vsyncadd (%p4308_p5), %s672_s10, 4294967264  ;;  %s690_s26 = scalar_lea.sflag [#allocation15], %s633_s28 }
  0x7d   : > { %4014 = dma.done.wait (%p4308_p5), %s690_s26, 4112  }
  0x7e   : > { %4016 = vsyncadd (%p4308_p5), %s690_s26, 4294963184  ;;  %s2873_s2 = sshll.u32 %s4409_s16, 8  ;;  %s709_s12 = scalar_lea.sflag [#allocation18], %s4409_s16 }
  0x7f   : > { %s4439_s30 = scalar_lea.vmem [#allocation16], %s2873_s2  ;;  %s4442_s18 = scalar_lea.vmem [#allocation17], %s2873_s2 }
  0x80   : > { %4018 = dma.done.wait (%p4308_p5), %s709_s12, 4096  }
  0x81   : > { %4020 = vsyncadd (%p4308_p5), %s709_s12, 4294963200  ;;  %s5239_s4 = sld [smem:[#allocation29_spill]]  ;;  %s4464_s9 = scalar_lea.vmem [#allocation19], %s2871_s21 }
  0x82   : > { %s5240_s27 = sld [smem:[#allocation48_spill]] }
  0x83   : > { %s5241_s0 = sld [smem:[#allocation46_spill]] }
  0x87   : > { %p801_p4 = scmp.lt.s32.totalorder %s5239_s4, 1  ;;  %p2877_p7 = scmp.ne.s32.totalorder %s5239_s4, 0 }
  0x89   : > { %s4450_s28 = scalar_select %p801_p4, %s5239_s4, 1 }
  0x8a   : > { %812 = sbr.rel (%p2877_p7) target bundleno = 146 (0x92), region = 112 }
  0x8b   : > { %s2876_s11 = sshll.u32 %s4450_s28, 2  ;;  %s807_s10 = scalar_lea.vmem %s5240_s27, %s4450_s28 }
  0x8c   : > { %s4460_s14 = scalar_lea.vmem %s5241_s0, %s2876_s11 }
  0x8f   : > { %v813_v0 = vld [vmem:[%s4401_s1] sm:$0xff]  ;;  %v814_v1 = vld [vmem:[%s4401_s1 + $0x8] sm:$0xff] }
  0x90   : > { %815 = vst [vmem:[%s4464_s9] sm:$0xff] %v813_v0 }
  0x91   : > { %816 = vst [vmem:[%s4464_s9 + $0x8] sm:$0xff] %v814_v1 }
  0x92 PF: > { %v4077_v4 = vmov 128.0   ;;  %v2964_v19 = vld [vmem:[%s4418_s19 + $0xa8] sm:$0xf]  ;;  %v3305_v20 = vld [vmem:[%s4418_s19 + $0xb0] sm:$0xf0]  ;;  %vm1084_vm7 = vcmask 261120  }
  0x93   : > { %3551 = vrcp.f32 %v4077_v4  ;;  %v3304_v21 = vld [vmem:[%s4418_s19 + $0xac] sm:$0xf]  ;;  %v2965_v22 = vor.u32 %v3305_v20, %v2964_v19  ;;  %v2966_v23 = vld [vmem:[%s4418_s19 + $0xb4] sm:$0xf0]  ;;  %v2972_v24 = vld [vmem:[%s4418_s19 + $0xb0] sm:$0xf] }
  0x94   : > { %v3306_v25 = vld [vmem:[%s4418_s19 + $0xb8] sm:$0xf0]  ;;  %v2969_v26 = vor.u32 %v3304_v21, %v2966_v23  ;;  %v2952_v28 = vld [vmem:[%s4418_s19 + $0x90] sm:$0xf]  ;;  %v3301_v30 = vld [vmem:[%s4418_s19 + $0x94] sm:$0xf] }
  0x95   : > { %v2973_v27 = vor.u32 %v3306_v25, %v2972_v24  ;;  %1039 = vmatpush.bf16.msra.mxu0 %v2965_v22  ;;  %v3302_v29 = vld [vmem:[%s4418_s19 + $0x98] sm:$0xf0]  ;;  %v2954_v32 = vld [vmem:[%s4418_s19 + $0x9c] sm:$0xf0]  ;;  %v2960_v33 = vld [vmem:[%s4418_s19 + $0x98] sm:$0xf] }
  0x96   : > { %1053 = vmatpush.bf16.msra.mxu1 %v2969_v26  ;;  %v2953_v31 = vor.u32 %v3302_v29, %v2952_v28  ;;  %v3303_v34 = vld [vmem:[%s4418_s19 + $0xa0] sm:$0xf0]  ;;  %v2957_v35 = vor.u32 %v3301_v30, %v2954_v32  ;;  %v2940_v37 = vld [vmem:[%s4418_s19 + $0x78] sm:$0xf]  ;;  %v3298_v39 = vld [vmem:[%s4418_s19 + $0x7c] sm:$0xf] }
  0x97   : > { %v4472_v2 = vld [vmem:[%s4464_s9] sm:$0xff]  ;;  %1067 = vmatpush.bf16.msra.mxu2 %v2973_v27  ;;  %v2961_v36 = vor.u32 %v3303_v34, %v2960_v33  ;;  %v2948_v42 = vld [vmem:[%s4418_s19 + $0x80] sm:$0xf]  ;;  %v2930_v50 = vld [vmem:[%s4418_s19 + $0x6c] sm:$0xf0]  ;;  %vm1105_vm8 = vcmask 130048  }
  0x98   : > { %819 = vadd.xlane.f32.xlu0 %v4472_v2  ;;  %v4476_v3 = vld [vmem:[%s4464_s9 + $0x8] sm:$0xff]  ;;  %v2942_v41 = vld [vmem:[%s4418_s19 + $0x84] sm:$0xf0]  ;;  %v2918_v59 = vld [vmem:[%s4418_s19 + $0x54] sm:$0xf0]  ;;  %s4078_s21 = smov 96  }
  0x99   : > { %v3552_v5 = vpop.eup %3551  ;;  %1040 = vmatpush.bf16.msra.mxu0 %v2953_v31  ;;  %v3299_v38 = vld [vmem:[%s4418_s19 + $0x80] sm:$0xf0]  ;;  %v3300_v43 = vld [vmem:[%s4418_s19 + $0x88] sm:$0xf0]  ;;  %v2945_v44 = vor.u32 %v3298_v39, %v2942_v41  ;;  %v2928_v46 = vld [vmem:[%s4418_s19 + $0x60] sm:$0xf] }
  0x9a   : > { %v824_v6 = vmul.f32 128.0, %v3552_v5  ;;  %vm828_vm0 = vweird.f32 %v3552_v5  ;;  %1054 = vmatpush.bf16.msra.mxu1 %v2957_v35  ;;  %v2941_v40 = vor.u32 %v3299_v38, %v2940_v37  ;;  %v2949_v45 = vor.u32 %v3300_v43, %v2948_v42  ;;  %v3296_v47 = vld [vmem:[%s4418_s19 + $0x68] sm:$0xf0]  ;;  %v3295_v48 = vld [vmem:[%s4418_s19 + $0x64] sm:$0xf]  ;;  %s4079_s1 = smov 64  }
  0x9b   : > { %1068 = vmatpush.bf16.msra.mxu2 %v2961_v36  ;;  %v2929_v49 = vor.u32 %v3296_v47, %v2928_v46  ;;  %v2936_v51 = vld [vmem:[%s4418_s19 + $0x68] sm:$0xf]  ;;  %v3297_v52 = vld [vmem:[%s4418_s19 + $0x70] sm:$0xf0]  ;;  %v2933_v53 = vor.u32 %v3295_v48, %v2930_v50  ;;  %v3292_v57 = vld [vmem:[%s4418_s19 + $0x4c] sm:$0xf] }
  0x9c   : > { %v825_v7 = vsub.f32 1.0, %v824_v6  ;;  %v2937_v54 = vor.u32 %v3297_v52, %v2936_v51  ;;  %v2916_v55 = vld [vmem:[%s4418_s19 + $0x48] sm:$0xf]  ;;  %v3293_v56 = vld [vmem:[%s4418_s19 + $0x50] sm:$0xf0]  ;;  %v2921_v62 = vor.u32 %v3292_v57, %v2918_v59  ;;  %s2570_s28 = sshll.u32 %s4464_s9, 4  ;;  %s2571_s28 = int_to_ptr.vmem [resolvable:$true] %s2570_s28 }
  0x9d   : > { %1041 = vmatpush.bf16.msra.mxu0 %v2941_v40  ;;  %v2917_v58 = vor.u32 %v3293_v56, %v2916_v55  ;;  %v2924_v60 = vld [vmem:[%s4418_s19 + $0x50] sm:$0xf]  ;;  %v3294_v61 = vld [vmem:[%s4418_s19 + $0x58] sm:$0xf0]  ;;  %v3289_v4 = vld [vmem:[%s4418_s19 + $0x34] sm:$0xf] }
  0x9e   : > { %v826_v8 = vmul.f32 %v3552_v5, %v825_v7  ;;  %1055 = vmatpush.bf16.msra.mxu1 %v2945_v44  ;;  %v2925_v63 = vor.u32 %v3294_v61, %v2924_v60  ;;  %v2904_v0 = vld [vmem:[%s4418_s19 + $0x30] sm:$0xf]  ;;  %v3290_v1 = vld [vmem:[%s4418_s19 + $0x38] sm:$0xf0]  ;;  %v2906_v6 = vld [vmem:[%s4418_s19 + $0x3c] sm:$0xf0] }
  0x9f   : > { %1069 = vmatpush.bf16.msra.mxu2 %v2949_v45  ;;  %v2912_v7 = vld [vmem:[%s4418_s19 + $0x38] sm:$0xf]  ;;  %v2900_v19 = vld [vmem:[%s4418_s19 + $0x20] sm:$0xf]  ;;  %v3288_v20 = vld [vmem:[%s4418_s19 + $0x28] sm:$0xf0] }
  0xa0   : > { %821 = vadd.xlane.f32.xlu0 %v4476_v3  ;;  %v827_v9 = vadd.f32 %v3552_v5, %v826_v8  ;;  %v3291_v8 = vld [vmem:[%s4418_s19 + $0x40] sm:$0xf0]  ;;  %v2901_v22 = vor.u32 %v3288_v20, %v2900_v19  ;;  %v2880_v23 = vld [vmem:[%s4418_s19] sm:$0xf]  ;;  %v3284_v24 = vld [vmem:[%s4418_s19 + $0x8] sm:$0xf0] }
  0xa1   : > { %1042 = vmatpush.bf16.msra.mxu0 %v2929_v49  ;;  %v3283_v25 = vld [vmem:[%s4418_s19 + $0x4] sm:$0xf]  ;;  %v2881_v27 = vor.u32 %v3284_v24, %v2880_v23  ;;  %v2882_v28 = vld [vmem:[%s4418_s19 + $0xc] sm:$0xf0]  ;;  %v2888_v29 = vld [vmem:[%s4418_s19 + $0x8] sm:$0xf] }
  0xa2   : > { %v4479_v10 = vsel %vm828_vm0, %v3552_v5, %v827_v9  ;;  %1056 = vmatpush.bf16.msra.mxu1 %v2933_v53  ;;  %v2905_v5 = vor.u32 %v3290_v1, %v2904_v0  ;;  %v2909_v9 = vor.u32 %v3289_v4, %v2906_v6  ;;  %v3285_v30 = vld [vmem:[%s4418_s19 + $0x10] sm:$0xf0]  ;;  %v2885_v32 = vor.u32 %v3283_v25, %v2882_v28  ;;  %v3545_v51 = vld [vmem:[%s636_s23] ss:$0 sm:$0xff]  ;;  %s4080_s23 = smov 32   ;;  %v3307_v28 = vld [vmem:[%s4425_s7] sm:$0xff] }
  0xa3   : > { %1070 = vmatpush.bf16.msra.mxu2 %v2937_v54  ;;  %v2889_v33 = vor.u32 %v3285_v30, %v2888_v29  ;;  %v3546_v56 = vld [vmem:[%s645_s20] ss:$0 sm:$0xff]  ;;  %s5248_s20 = scalar_lea.vmem [#allocation13], %s4409_s16  ;;  %s2558_s5 = scalar_lea.sflag [#allocation4], %s4395_s15 }
  0xa5   : > { %1043 = vmatpush.bf16.msra.mxu0 %v2917_v58 }
  0xa6   : > { %1057 = vmatpush.bf16.msra.mxu1 %v2921_v62 }
  0xa7   : > { %1071 = vmatpush.bf16.msra.mxu2 %v2925_v63 }
  0xa9   : > { %1044 = vmatpush.bf16.msra.mxu0 %v2905_v5 }
  0xaa   : > { %1058 = vmatpush.bf16.msra.mxu1 %v2909_v9 }
 0x10b   : > { %v820_v11 = vpop.xlane.xlu0 %819 }
 0x10c   : > { %v830_v12 = vmul.f32 %v4479_v10, %v820_v11  ;;  %v2913_v11 = vor.u32 %v3291_v8, %v2912_v7 }
 0x10e   : > { %v4483_v13 = vsub.f32 %v4472_v2, %v830_v12  ;;  %1072 = vmatpush.bf16.msra.mxu2 %v2913_v11  ;;  %v2892_v12 = vld [vmem:[%s4418_s19 + $0x18] sm:$0xf] }
 0x110   : > { %v834_v14 = vmul.f32 %v4483_v13, %v4483_v13 }
 0x112   : > { %836 = vadd.xlane.f32.xlu1 %v834_v14  ;;  %v3287_v14 = vld [vmem:[%s4418_s19 + $0x20] sm:$0xf0]  ;;  %1073 = vmatpush.bf16.msra.mxu2 %v2901_v22 }
 0x113   : > { %v822_v15 = vpop.xlane.xlu0 %821 }
 0x114   : > { %v831_v16 = vmul.f32 %v4479_v10, %v822_v15  ;;  %v3286_v15 = vld [vmem:[%s4418_s19 + $0x1c] sm:$0xf] }
 0x116   : > { %v4489_v17 = vsub.f32 %v4476_v3, %v831_v16  ;;  %v2893_v16 = vor.u32 %v3287_v14, %v2892_v12  ;;  %1074 = vmatpush.bf16.msra.mxu2 %v2889_v33 }
 0x118   : > { %v835_v18 = vmul.f32 %v4489_v17, %v4489_v17  ;;  %1045 = vmatpush.bf16.msra.mxu0 %v2893_v16 }
 0x11a   : > { %838 = vadd.xlane.f32.xlu1 %v835_v18  ;;  %v2894_v18 = vld [vmem:[%s4418_s19 + $0x24] sm:$0xf0]  ;;  %s5249_s19 = scalar_lea.vmem [#allocation14], %s4409_s16  ;;  %s5254_s16 = sld [smem:[#allocation30_spill]] }
 0x11b   : > { %v2897_v21 = vor.u32 %v3286_v15, %v2894_v18 }
 0x11c   : > { %1046 = vmatpush.bf16.msra.mxu0 %v2881_v27 }
 0x11d   : > { %1059 = vmatpush.bf16.msra.mxu1 %v2897_v21 }
 0x120   : > { %s3379_s0 = sshll.u32 %s5254_s16, 4 }
 0x121   : > { %1060 = vmatpush.bf16.msra.mxu1 %v2885_v32 }
 0x185   : > { %v837_v26 = vpop.xlane.xlu1 %836 }
 0x186   : > { %v840_v31 = vmul.f32 %v837_v26, %v4479_v10  ;;  %v3308_v26 = vld [vmem:[%s4425_s7 + $0x8] sm:$0xff] }
 0x187   : > { %1328 = vmatpush.bf16.msrb.mxu2 %v3308_v26 }
 0x188   : > { %v842_v34 = vadd.f32 1e-05, %v840_v31 }
 0x18a   : > { %3553 = vrsqrt.f32 %v842_v34  ;;  %vm850_vm2 = vweird.f32 %v842_v34 }
 0x18b   : > { %1329 = vmatpush.bf16.msrb.mxu2 %v3307_v28 }
 0x18d   : > { %v839_v35 = vpop.xlane.xlu1 %838 }
 0x18e   : > { %v841_v36 = vmul.f32 %v839_v35, %v4479_v10 }
 0x190   : > { %v3554_v37 = vpop.eup %3553  ;;  %v843_v38 = vadd.f32 1e-05, %v841_v36 }
 0x191   : > { %v845_v39 = vmul.f32 %v3554_v37, %v842_v34  ;;  %vm851_vm1 = vweird.f32 %v3554_v37 }
 0x192   : > { %3555 = vrsqrt.f32 %v843_v38  ;;  %vm852_vm3 = vmor %vm850_vm2, %vm851_vm1  ;;  %vm860_vm5 = vweird.f32 %v843_v38 }
 0x193   : > { %v846_v40 = vmul.f32 %v3554_v37, %v845_v39 }
 0x195   : > { %v847_v41 = vmul.f32 0.5, %v846_v40 }
 0x197   : > { %v848_v42 = vsub.f32 1.5, %v847_v41 }
 0x198   : > { %v3556_v43 = vpop.eup %3555 }
 0x199   : > { %v849_v44 = vmul.f32 %v3554_v37, %v848_v42  ;;  %v855_v45 = vmul.f32 %v3556_v43, %v843_v38  ;;  %vm861_vm4 = vweird.f32 %v3556_v43 }
 0x19a   : > { %vm862_vm6 = vmor %vm860_vm5, %vm861_vm4 }
 0x19b   : > { %v856_v46 = vmul.f32 %v3556_v43, %v855_v45  ;;  %v853_v47 = vsel %vm852_vm3, %v3554_v37, %v849_v44 }
 0x19c   : > { %v864_v50 = vmul.f32 %v853_v47, %v4483_v13 }
 0x19d   : > { %v857_v48 = vmul.f32 0.5, %v856_v46 }
 0x19e   : > { %v870_v55 = vmul.f32 %v3545_v51, %v864_v50 }
 0x19f   : > { %v858_v49 = vsub.f32 1.5, %v857_v48 }
 0x1a0   : > { %v876_v58 = vadd.f32 %v3546_v56, %v870_v55 }
 0x1a1   : > { %v859_v52 = vmul.f32 %v3556_v43, %v858_v49 }
 0x1a3   : > { %v863_v53 = vsel %vm862_vm6, %v3556_v43, %v859_v52 }
 0x1a4   : > { %v865_v54 = vmul.f32 %v863_v53, %v4489_v17 }
 0x1a6   : > { %v871_v57 = vmul.f32 %v3545_v51, %v865_v54 }
 0x1a8   : > { %v877_v59 = vadd.f32 %v3546_v56, %v871_v57 }
 0x1aa   : > { %v878_v60 = vpack.c.bf16 %v877_v59, %v876_v58 }
 0x1ac   : > { %1047 = vmatmul.bf16.vlgmr.msra.gmra.mxu0 %v878_v60  ;;  %1061 = vmatmul.bf16.vlgmr.msra.gmra.mxu1 %v878_v60 }
 0x1ad   : > { %1075 = vmatmul.bf16.vlgmr.msra.gmra.mxu2 %v878_v60 }
 0x229   : > { %v1062_v61 = vpop.f32.mrf.mxu1  ;;  %v1048_v13 = vpop.f32.mrf.mxu0 }
 0x230   : > { %v1076_v62 = vpop.f32.mrf.mxu2 }
 0x231   : > { %v1064_v63 = vpop.f32.mrf.mxu1  ;;  %v1050_v17 = vpop.f32.mrf.mxu0 }
 0x232   : > { %v1082_v0 = vpack.c.bf16 %v1064_v63, %v1062_v61  ;;  %v1081_v6 = vpack.c.bf16 %v1050_v17, %v1048_v13 }
 0x234   : > { %v1089_v1 = vsel %vm1084_vm7, %v1082_v0, 0 }
 0x235   : > { %1098 = vmatpush.bf16.xpose.msra.mxu3 %v1089_v1 }
 0x238   : > { %v1078_v4 = vpop.f32.mrf.mxu2 }
 0x239   : > { %v4550_v5 = vpack.c.bf16 %v1078_v4, %v1076_v62 }
 0x23c   : > { %2974 = vmatmul.msk.bf16.vlgmr.msra.gmra.mxu3 %vm1084_vm7, %v1081_v6 }
 0x23d   : > { %1165 = vmatpush.bf16.msrb.mxu3 %v4550_v5 }
 0x2bf   : > { %v1100_v7 = vpop.f32.mrf.mxu3 }
 0x2c0   : > { %v1106_v8 = vsel %vm1105_vm8, %v1100_v7, -inf }
 0x2c1   : > { %1107 = vmax.xlane.f32.xlu2 %v1106_v8 }
 0x2c7   : > { %v1102_v9 = vpop.f32.mrf.mxu3 }
 0x2c8   : > { %v1109_v11 = vsel %vm1105_vm8, %v1102_v9, -inf }
 0x2c9   : > { %1110 = vmax.xlane.f32.xlu2 %v1109_v11 }
 0x2e1   : > { %1181 = vrot.lane.b32.xlu2 %v1082_v0, %s4078_s21 }
 0x2e9   : > { %1338 = vrot.lane.b32.xlu2 %v1082_v0, %s4079_s1 }
 0x2f1   : > { %1336 = vrot.lane.b32.xlu2 %v1081_v6, %s4079_s1 }
 0x334   : > { %v1108_v12 = vpop.xlane.xlu2 %1107 }
 0x335   : > { %v1112_v14 = vsub.f32 %v1100_v7, %v1108_v12 }
 0x337   : > { %v1114_v15 = vmul.f32 1.442695, %v1112_v14 }
 0x339   : > { %3557 = vpow2.f32 %v1114_v15 }
 0x33c   : > { %v1111_v16 = vpop.xlane.xlu2 %1110 }
 0x33d   : > { %v1113_v18 = vsub.f32 %v1102_v9, %v1111_v16 }
 0x33f   : > { %v3558_v19 = vpop.eup %3557  ;;  %v1116_v20 = vmul.f32 1.442695, %v1113_v18 }
 0x340   : > { %v1118_v21 = vsel %vm1105_vm8, %v3558_v19, 0.0 }
 0x341   : > { %3559 = vpow2.f32 %v1116_v20  ;;  %1119 = vadd.xlane.f32.xlu0 %v1118_v21 }
 0x344   : > { %v1182_v22 = vpop.permute.xlu2 %1181 }
 0x345   : > { %v1187_v23 = vsel %vm1084_vm7, %v1182_v22, 0 }
 0x346   : > { %1196 = vmatpush.bf16.xpose.msra.mxu3 %v1187_v23 }
 0x347   : > { %v3560_v24 = vpop.eup %3559 }
 0x348   : > { %v1121_v25 = vsel %vm1105_vm8, %v3560_v24, 0.0 }
 0x349   : > { %1122 = vadd.xlane.f32.xlu1 %v1121_v25 }
 0x34c   : > { %v1339_v52 = vpop.permute.xlu2 %1338 }
 0x34d   : > { %v1344_v54 = vsel %vm1084_vm7, %v1339_v52, 0 }
 0x354   : > { %v1337_v58 = vpop.permute.xlu2 %1336 }
 0x355   : > { %1178 = vrot.lane.b32.xlu0 %v1081_v6, %s4078_s21 }
 0x35d   : > { %1465 = vrot.lane.b32.xlu0 %v1081_v6, %s4080_s23 }
 0x362   : > { %1467 = vrot.lane.b32.xlu1 %v1082_v0, %s4080_s23 }
 0x3b4   : > { %v1120_v27 = vpop.xlane.xlu0 %1119 }
 0x3b5   : > { %3561 = vrcp.f32 %v1120_v27  ;;  %v1135_v37 = vand.u32 2147483648, %v1120_v27  ;;  %vm1129_vm10 = vweird.f32 %v1120_v27  ;;  %v1133_v38 = vand.u32 2147483647, %v1120_v27 }
 0x3b7   : > { %v1136_v44 = vor.u32 1.1754944e-38, %v1135_v37  ;;  %vm1134_vm13 = vcmp.eq.f32.partialorder %v1133_v38, 8.507059e+37 }
 0x3bb   : > { %v3562_v29 = vpop.eup %3561 }
 0x3bc   : > { %v1125_v30 = vmul.f32 %v3562_v29, %v1120_v27  ;;  %v1123_v31 = vpop.xlane.xlu1 %1122  ;;  %vm1130_vm9 = vweird.f32 %v3562_v29 }
 0x3bd   : > { %3563 = vrcp.f32 %v1123_v31  ;;  %vm1131_vm11 = vmor %vm1129_vm10, %vm1130_vm9  ;;  %v1150_v40 = vand.u32 2147483648, %v1123_v31  ;;  %v1148_v43 = vand.u32 2147483647, %v1123_v31  ;;  %vm1144_vm14 = vweird.f32 %v1123_v31 }
 0x3be   : > { %v1126_v32 = vsub.f32 1.0, %v1125_v30 }
 0x3bf   : > { %v1151_v46 = vor.u32 1.1754944e-38, %v1150_v40  ;;  %vm1149_vm0 = vcmp.eq.f32.partialorder %v1148_v43, 8.507059e+37 }
 0x3c0   : > { %v1127_v33 = vmul.f32 %v3562_v29, %v1126_v32 }
 0x3c2   : > { %v1128_v35 = vadd.f32 %v3562_v29, %v1127_v33 }
 0x3c3   : > { %v3564_v34 = vpop.eup %3563 }
 0x3c4   : > { %v1140_v36 = vmul.f32 %v3564_v34, %v1123_v31  ;;  %v1132_v41 = vsel %vm1131_vm11, %v3562_v29, %v1128_v35  ;;  %vm1145_vm12 = vweird.f32 %v3564_v34 }
 0x3c5   : > { %vm1146_vm15 = vmor %vm1144_vm14, %vm1145_vm12  ;;  %v1137_v47 = vsel %vm1134_vm13, %v1136_v44, %v1132_v41 }
 0x3c6   : > { %v1141_v39 = vsub.f32 1.0, %v1140_v36  ;;  %v1138_v50 = vmul.f32 %v3558_v19, %v1137_v47 }
 0x3c7   : > { %v1179_v57 = vpop.permute.xlu0 %1178 }
 0x3c8   : > { %v1142_v42 = vmul.f32 %v3564_v34, %v1141_v39 }
 0x3ca   : > { %v1143_v45 = vadd.f32 %v3564_v34, %v1142_v42 }
 0x3cc   : > { %v1147_v48 = vsel %vm1146_vm15, %v3564_v34, %v1143_v45 }
 0x3cd   : > { %v1152_v49 = vsel %vm1149_vm0, %v1151_v46, %v1147_v48 }
 0x3ce   : > { %v1153_v51 = vmul.f32 %v3560_v24, %v1152_v49 }
 0x3cf   : > { %v1466_v1 = vpop.permute.xlu0 %1465 }
 0x3d0   : > { %v1154_v53 = vpack.c.bf16 %v1153_v51, %v1138_v50 }
 0x3d2   : > { %2975 = vmatmul.msk.bf16.vlgmr.msrb.gmra.mxu3 %vm1105_vm8, %v1154_v53 }
 0x3d3   : > { %1353 = vmatpush.bf16.xpose.msrb.mxu3 %v1344_v54 }
 0x3d4   : > { %v1468_v55 = vpop.permute.xlu1 %1467 }
 0x3d5   : > { %v1473_v56 = vsel %vm1084_vm7, %v1468_v55, 0 }
 0x3d6   : > { %1482 = vmatpush.bf16.xpose.msra.mxu2 %v1473_v56 }
 0x3e2   : > { %2976 = vmatmul.msk.bf16.vlgmr.msra.gmra.mxu3 %vm1084_vm7, %v1179_v57 }
 0x3f2   : > { %2996 = vmatmul.msk.bf16.vlgmr.msrb.gmra.mxu3 %vm1084_vm7, %v1337_v58 }
 0x455   : > { %v1167_v59 = vpop.f32.mrf.mxu3 }
 0x45d   : > { %v1169_v60 = vpop.f32.mrf.mxu3 }
 0x45e   : > { %v1172_v61 = vpack.c.bf16 %v1169_v60, %v1167_v59 }
 0x460   : > { %2995 = vmatmul.msk.bf16.vlgmr.msrb.gmra.mxu2 %vm1084_vm7, %v1172_v61 }
 0x465   : > { %v1198_v13 = vpop.f32.mrf.mxu3 }
 0x466   : > { %v1203_v62 = vsel %vm1105_vm8, %v1198_v13, -inf }
 0x467   : > { %1204 = vmax.xlane.f32.xlu1 %v1203_v62 }
 0x46d   : > { %v1200_v63 = vpop.f32.mrf.mxu3 }
 0x46e   : > { %v1206_v0 = vsel %vm1105_vm8, %v1200_v63, -inf }
 0x46f   : > { %1207 = vmax.xlane.f32.xlu0 %v1206_v0 }
 0x470   : > { %3007 = vmatmul.msk.bf16.vlgmr.msra.gmra.mxu2 %vm1084_vm7, %v1466_v1 }
 0x475   : > { %v1355_v17 = vpop.f32.mrf.mxu3 }
 0x476   : > { %v1360_v4 = vsel %vm1105_vm8, %v1355_v17, -inf }
 0x477   : > { %1361 = vmax.xlane.f32.xlu0 %v1360_v4 }
 0x47d   : > { %v1357_v26 = vpop.f32.mrf.mxu3 }
 0x47e   : > { %v1363_v29 = vsel %vm1105_vm8, %v1357_v26, -inf }
 0x4da   : > { %v1205_v19 = vpop.xlane.xlu1 %1204 }
 0x4db   : > { %v1209_v20 = vsub.f32 %v1198_v13, %v1205_v19 }
 0x4dd   : > { %v1211_v25 = vmul.f32 1.442695, %v1209_v20 }
 0x4e2   : > { %v1208_v6 = vpop.xlane.xlu0 %1207 }
 0x4e3   : > { %v1210_v7 = vsub.f32 %v1200_v63, %v1208_v6  ;;  %v4577_v8 = vpop.f32.mrf.mxu2 }
 0x4e5   : > { %v1213_v9 = vmul.f32 1.442695, %v1210_v7 }
 0x4e7   : > { %3565 = vpow2.f32 %v1213_v9 }
 0x4ea   : > { %v1362_v11 = vpop.xlane.xlu0 %1361 }
 0x4eb   : > { %v1366_v12 = vsub.f32 %v1355_v17, %v1362_v11  ;;  %v4579_v14 = vpop.f32.mrf.mxu2 }
 0x4ed   : > { %v4581_v15 = vpop.eup %3565  ;;  %v1368_v16 = vmul.f32 1.442695, %v1366_v12 }
 0x4ee   : > { %v1218_v18 = vsel %vm1105_vm8, %v4581_v15, 0.0 }
 0x4ef   : > { %3567 = vpow2.f32 %v1368_v16  ;;  %1219 = vadd.xlane.f32.xlu0 %v1218_v18  ;;  %v3312_v16 = vld [vmem:[%s4425_s7 + $0x28] sm:$0xff] }
 0x4f0   : > { %3569 = vpow2.f32 %v1211_v25 }
 0x4f3   : > { %v1484_v21 = vpop.f32.mrf.mxu2 }
 0x4f4   : > { %v1489_v22 = vsel %vm1105_vm8, %v1484_v21, -inf }
 0x4f5   : > { %v4586_v23 = vpop.eup %3567  ;;  %1490 = vmax.xlane.f32.xlu2 %v1489_v22 }
 0x4f6   : > { %v1372_v24 = vsel %vm1105_vm8, %v4586_v23, 0.0  ;;  %v4592_v30 = vpop.eup %3569 }
 0x4f7   : > { %1373 = vadd.xlane.f32.xlu0 %v1372_v24  ;;  %v1215_v31 = vsel %vm1105_vm8, %v4592_v30, 0.0 }
 0x4fb   : > { %v1486_v27 = vpop.f32.mrf.mxu2 }
 0x4fc   : > { %v1492_v28 = vsel %vm1105_vm8, %v1486_v27, -inf }
 0x4fd   : > { %1493 = vmax.xlane.f32.xlu1 %v1492_v28  ;;  %1364 = vmax.xlane.f32.xlu2 %v1363_v29 }
 0x505   : > { %1216 = vadd.xlane.f32.xlu1 %v1215_v31 }
 0x50b   : > { %1538 = vrot.lane.b32.xlu0 %v4550_v5, %s4080_s23 }
 0x562   : > { %v4598_v33 = vpop.xlane.xlu0 %1219 }
 0x563   : > { %v1245_v0 = vand.u32 2147483647, %v4598_v33  ;;  %vm1241_vm3 = vweird.f32 %v4598_v33  ;;  %v1247_v9 = vand.u32 2147483648, %v4598_v33 }
 0x565   : > { %vm4641_vm9 = vcmp.eq.f32.partialorder %v1245_v0, 8.507059e+37 }
 0x568   : > { %v1491_v32 = vpop.xlane.xlu2 %1490 }
 0x569   : > { %v1495_v40 = vsub.f32 %v1484_v21, %v1491_v32 }
 0x56a   : > { %v4600_v41 = vpop.xlane.xlu0 %1373 }
 0x56b   : > { %v1497_v42 = vmul.f32 1.442695, %v1495_v40 }
 0x570   : > { %v1494_v34 = vpop.xlane.xlu1 %1493  ;;  %v1365_v35 = vpop.xlane.xlu2 %1364 }
 0x571   : > { %v1496_v36 = vsub.f32 %v1486_v27, %v1494_v34  ;;  %v1367_v37 = vsub.f32 %v1357_v26, %v1365_v35  ;;  %v1248_v27 = vor.u32 1.1754944e-38, %v1247_v9  ;;  %v3309_v9 = vld [vmem:[%s4425_s7 + $0x10] sm:$0xff] }
 0x573   : > { %v1499_v38 = vmul.f32 1.442695, %v1496_v36  ;;  %v1370_v39 = vmul.f32 1.442695, %v1367_v37 }
 0x575   : > { %3571 = vpow2.f32 %v1499_v38 }
 0x576   : > { %3573 = vpow2.f32 %v1370_v39 }
 0x577   : > { %3575 = vpow2.f32 %v1497_v42 }
 0x578   : > { %v1217_v50 = vpop.xlane.xlu1 %1216  ;;  %3577 = vrcp.f32 %v4598_v33 }
 0x579   : > { %3579 = vrcp.f32 %v1217_v50  ;;  %v1232_v4 = vand.u32 2147483648, %v1217_v50  ;;  %vm1226_vm5 = vweird.f32 %v1217_v50  ;;  %v1230_v11 = vand.u32 2147483647, %v1217_v50 }
 0x57b   : > { %v4602_v43 = vpop.eup %3571  ;;  %v1233_v24 = vor.u32 1.1754944e-38, %v1232_v4  ;;  %vm1231_vm11 = vcmp.eq.f32.partialorder %v1230_v11, 8.507059e+37  ;;  %v3314_v11 = vld [vmem:[%s4425_s7 + $0x38] sm:$0xff] }
 0x57c   : > { %v4604_v44 = vpop.eup %3573  ;;  %v1504_v45 = vsel %vm1105_vm8, %v4602_v43, 0.0 }
 0x57d   : > { %1505 = vadd.xlane.f32.xlu1 %v1504_v45  ;;  %v1539_v46 = vpop.permute.xlu0 %1538  ;;  %v1375_v47 = vsel %vm1105_vm8, %v4604_v44, 0.0  ;;  %v4610_v48 = vpop.eup %3575 }
 0x57e   : > { %1376 = vadd.xlane.f32.xlu2 %v1375_v47  ;;  %1551 = vmatpush.bf16.msra.mxu3 %v1539_v46  ;;  %v1501_v49 = vsel %vm1105_vm8, %v4610_v48, 0.0  ;;  %v3578_v51 = vpop.eup %3577 }
 0x57f   : > { %v3580_v52 = vpop.eup %3579  ;;  %v1237_v53 = vmul.f32 %v3578_v51, %v4598_v33  ;;  %vm1242_vm1 = vweird.f32 %v3578_v51 }
 0x580   : > { %v1222_v54 = vmul.f32 %v3580_v52, %v1217_v50  ;;  %vm1227_vm2 = vweird.f32 %v3580_v52  ;;  %vm4628_vm4 = vmor %vm1241_vm3, %vm1242_vm1 }
 0x581   : > { %v1238_v57 = vsub.f32 1.0, %v1237_v53  ;;  %vm4635_vm6 = vmor %vm1226_vm5, %vm1227_vm2 }
 0x582   : > { %v1223_v58 = vsub.f32 1.0, %v1222_v54 }
 0x583   : > { %v1239_v60 = vmul.f32 %v3578_v51, %v1238_v57 }
 0x585   : > { %v1240_v63 = vadd.f32 %v3578_v51, %v1239_v60 }
 0x586   : > { %1502 = vadd.xlane.f32.xlu2 %v1501_v49 }
 0x587   : > { %v1244_v19 = vsel %vm4628_vm4, %v3578_v51, %v1240_v63 }
 0x588   : > { %v1249_v36 = vsel %vm4641_vm9, %v1248_v27, %v1244_v19  ;;  %vm1383_vm9 = vweird.f32 %v4600_v41 }
 0x596   : > { %1253 = vrot.lane.b32.xlu1 %v4550_v5, %s4078_s21 }
 0x59e   : > { %1409 = vrot.lane.b32.xlu2 %v4550_v5, %s4079_s1  ;;  %v1224_v5 = vmul.f32 %v3580_v52, %v1223_v58 }
 0x5a0   : > { %v1225_v1 = vadd.f32 %v3580_v52, %v1224_v5 }
 0x5a2   : > { %v1229_v21 = vsel %vm4635_vm6, %v3580_v52, %v1225_v1  ;;  %v1250_v52 = vmul.f32 %v4581_v15, %v1249_v36 }
 0x5a3   : > { %v1234_v33 = vsel %vm1231_vm11, %v1233_v24, %v1229_v21 }
 0x5a4   : > { %v1235_v45 = vmul.f32 %v4592_v30, %v1234_v33 }
 0x5a6   : > { %v1251_v30 = vpack.c.bf16 %v1250_v52, %v1235_v45 }
 0x5f0   : > { %v1506_v55 = vpop.xlane.xlu1 %1505 }
 0x5f1   : > { %3581 = vrcp.f32 %v1506_v55  ;;  %v4620_v56 = vpop.xlane.xlu2 %1376  ;;  %v1533_v29 = vand.u32 2147483648, %v1506_v55  ;;  %vm1527_vm12 = vweird.f32 %v1506_v55  ;;  %v1531_v31 = vand.u32 2147483647, %v1506_v55 }
 0x5f2   : > { %3583 = vrcp.f32 %v4620_v56  ;;  %v1404_v15 = vand.u32 2147483648, %v4620_v56  ;;  %vm1398_vm5 = vweird.f32 %v4620_v56 }
 0x5f3   : > { %3585 = vrcp.f32 %v4600_v41  ;;  %v1534_v42 = vor.u32 1.1754944e-38, %v1533_v29  ;;  %vm1532_vm15 = vcmp.eq.f32.partialorder %v1531_v31, 8.507059e+37 }
 0x5f4   : > { %v1405_v63 = vor.u32 1.1754944e-38, %v1404_v15 }
 0x5f7   : > { %v3582_v59 = vpop.eup %3581 }
 0x5f8   : > { %v1523_v61 = vmul.f32 %v3582_v59, %v1506_v55  ;;  %v4625_v17 = vpop.eup %3583  ;;  %vm1528_vm10 = vweird.f32 %v3582_v59 }
 0x5f9   : > { %v1503_v13 = vpop.xlane.xlu2 %1502  ;;  %v4633_v12 = vpop.eup %3585  ;;  %v1394_v22 = vmul.f32 %v4625_v17, %v4620_v56  ;;  %vm1529_vm13 = vmor %vm1527_vm12, %vm1528_vm10  ;;  %vm1399_vm3 = vweird.f32 %v4625_v17 }
 0x5fa   : > { %v1524_v62 = vsub.f32 1.0, %v1523_v61  ;;  %3587 = vrcp.f32 %v1503_v13  ;;  %v1379_v28 = vmul.f32 %v4633_v12, %v4600_v41  ;;  %v1518_v35 = vand.u32 2147483648, %v1503_v13  ;;  %vm1400_vm6 = vmor %vm1398_vm5, %vm1399_vm3 }
 0x5fb   : > { %v1395_v34 = vsub.f32 1.0, %v1394_v22  ;;  %v1516_v39 = vand.u32 2147483647, %v1503_v13  ;;  %vm1512_vm0 = vweird.f32 %v1503_v13  ;;  %vm1384_vm4 = vweird.f32 %v4633_v12 }
 0x5fc   : > { %v1525_v6 = vmul.f32 %v3582_v59, %v1524_v62  ;;  %v1380_v40 = vsub.f32 1.0, %v1379_v28  ;;  %v1519_v50 = vor.u32 1.1754944e-38, %v1518_v35  ;;  %vm1385_vm10 = vmor %vm1383_vm9, %vm1384_vm4  ;;  %v3547_v35 = vld [vmem:[%s674_s17] ss:$0 sm:$0xff] }
 0x5fd   : > { %v1396_v49 = vmul.f32 %v4625_v17, %v1395_v34  ;;  %vm1517_vm2 = vcmp.eq.f32.partialorder %v1516_v39, 8.507059e+37 }
 0x5fe   : > { %v1526_v25 = vadd.f32 %v3582_v59, %v1525_v6  ;;  %v1381_v55 = vmul.f32 %v4633_v12, %v1380_v40 }
 0x5ff   : > { %v1397_v60 = vadd.f32 %v4625_v17, %v1396_v49 }
 0x600   : > { %v3588_v18 = vpop.eup %3587  ;;  %v1530_v37 = vsel %vm1529_vm13, %v3582_v59, %v1526_v25  ;;  %v1382_v61 = vadd.f32 %v4633_v12, %v1381_v55  ;;  %v3343_v55 = vld [vmem:[%s4439_s30 + $0xe4] sm:$0xf] }
 0x601   : > { %v1508_v26 = vmul.f32 %v3588_v18, %v1503_v13  ;;  %vm1513_vm14 = vweird.f32 %v3588_v18  ;;  %v1535_v47 = vsel %vm1532_vm15, %v1534_v42, %v1530_v37  ;;  %v1410_v54 = vpop.permute.xlu2 %1409  ;;  %v1402_v13 = vand.u32 2147483647, %v4620_v56 }
 0x602   : > { %vm1514_vm1 = vmor %vm1512_vm0, %vm1513_vm14  ;;  %v1536_v58 = vmul.f32 %v4602_v43, %v1535_v47  ;;  %v1389_v43 = vand.u32 2147483648, %v4600_v41  ;;  %v1401_v62 = vsel %vm1400_vm6, %v4625_v17, %v1397_v60  ;;  %v1386_v0 = vsel %vm1385_vm10, %v4633_v12, %v1382_v61  ;;  %v3310_v17 = vld [vmem:[%s4425_s7 + $0x18] sm:$0xff]  ;;  %v3313_v12 = vld [vmem:[%s4425_s7 + $0x30] sm:$0xff] }
 0x603   : > { %v1509_v32 = vsub.f32 1.0, %v1508_v26  ;;  %vm1403_vm11 = vcmp.eq.f32.partialorder %v1402_v13, 8.507059e+37  ;;  %1299 = vmatpush.bf16.msrb.mxu1 %v3310_v17  ;;  %v3142_v61 = vld [vmem:[%s4439_s30 + $0xf8] sm:$0xf0] }
 0x604   : > { %v1390_v56 = vor.u32 1.1754944e-38, %v1389_v43  ;;  %v1406_v1 = vsel %vm1403_vm11, %v1405_v63, %v1401_v62  ;;  %v3116_v43 = vld [vmem:[%s4439_s30 + $0xc0] sm:$0xf]  ;;  %v3339_v62 = vld [vmem:[%s4439_s30 + $0xc4] sm:$0xf] }
 0x605   : > { %v1510_v38 = vmul.f32 %v3588_v18, %v1509_v32  ;;  %v1407_v6 = vmul.f32 %v4604_v44, %v1406_v1  ;;  %v3342_v1 = vld [vmem:[%s4439_s30 + $0xd4] sm:$0xf0] }
 0x607   : > { %v1511_v46 = vadd.f32 %v3588_v18, %v1510_v38  ;;  %1300 = vmatpush.bf16.msrb.mxu1 %v3309_v9  ;;  %v3100_v9 = vld [vmem:[%s4439_s30 + $0xa0] sm:$0xf] }
 0x608   : > { %v1254_v51 = vpop.permute.xlu1 %1253 }
 0x609   : > { %v1515_v53 = vsel %vm1514_vm1, %v3588_v18, %v1511_v46  ;;  %1266 = vmatpush.bf16.msrb.mxu0 %v1254_v51  ;;  %v3311_v18 = vld [vmem:[%s4425_s7 + $0x20] sm:$0xff] }
 0x60a   : > { %v1520_v57 = vsel %vm1517_vm2, %v1519_v50, %v1515_v53  ;;  %v3132_v53 = vld [vmem:[%s4439_s30 + $0xe0] sm:$0xf] }
 0x60b   : > { %v1521_v59 = vmul.f32 %v4610_v48, %v1520_v57  ;;  %v1387_v48 = vand.u32 2147483647, %v4600_v41  ;;  %1455 = vmatpush.bf16.msra.mxu1 %v3312_v16 }
 0x60c   : > { %2977 = vmatmul.msk.bf16.vlgmr.msrb.gmra.mxu0 %vm1105_vm8, %v1251_v30  ;;  %v3134_v30 = vld [vmem:[%s4439_s30 + $0xf0] sm:$0xf0] }
 0x60d   : > { %1422 = vmatpush.bf16.msra.mxu0 %v1410_v54  ;;  %v1537_v5 = vpack.c.bf16 %v1536_v58, %v1521_v59  ;;  %vm1388_vm12 = vcmp.eq.f32.partialorder %v1387_v48, 8.507059e+37  ;;  %v3345_v54 = vld [vmem:[%s4439_s30 + $0xec] sm:$0xf0]  ;;  %v3140_v58 = vld [vmem:[%s4439_s30 + $0xe8] sm:$0xf]  ;;  %v3137_v60 = vor.u32 %v3343_v55, %v3134_v30 }
 0x60e   : > { %v1391_v4 = vsel %vm1388_vm12, %v1390_v56, %v1386_v0  ;;  %v3133_v57 = vor.u32 %v3345_v54, %v3132_v53  ;;  %v3346_v59 = vld [vmem:[%s4439_s30 + $0xf4] sm:$0xf0]  ;;  %v3341_v48 = vld [vmem:[%s4439_s30 + $0xcc] sm:$0xf0]  ;;  %v3118_v0 = vld [vmem:[%s4439_s30 + $0xd0] sm:$0xf0] }
 0x60f   : > { %3008 = vmatmul.msk.bf16.vlgmr.msra.gmra.mxu3 %vm1105_vm8, %v1537_v5  ;;  %v1392_v41 = vmul.f32 %v4586_v23, %v1391_v4  ;;  %1456 = vmatpush.bf16.msra.mxu1 %v3311_v18  ;;  %v3141_v15 = vor.u32 %v3346_v59, %v3140_v58  ;;  %v3344_v5 = vld [vmem:[%s4439_s30 + $0xec] sm:$0xf]  ;;  %v3117_v63 = vor.u32 %v3341_v48, %v3116_v43  ;;  %v3124_v56 = vld [vmem:[%s4439_s30 + $0xc8] sm:$0xf]  ;;  %v3102_v18 = vld [vmem:[%s4439_s30 + $0xb0] sm:$0xf0] }
 0x610   : > { %v3145_v13 = vor.u32 %v3344_v5, %v3142_v61  ;;  %1871 = vmatpush.bf16.msrb.mxu2 %v3137_v60  ;;  %v3121_v4 = vor.u32 %v3339_v62, %v3118_v0  ;;  %v3052_v54 = vld [vmem:[%s4439_s30 + $0x40] sm:$0xf]  ;;  %v3325_v55 = vld [vmem:[%s4439_s30 + $0x4c] sm:$0xf0]  ;;  %v3054_v58 = vld [vmem:[%s4439_s30 + $0x50] sm:$0xf0] }
 0x611   : > { %v1408_v7 = vpack.c.bf16 %v1407_v6, %v1392_v41  ;;  %1584 = vmatpush.bf16.msrb.mxu0 %v3314_v11  ;;  %1885 = vmatpush.bf16.msrb.mxu3 %v3141_v15  ;;  %v3125_v6 = vor.u32 %v3342_v1, %v3124_v56  ;;  %v3340_v41 = vld [vmem:[%s4439_s30 + $0xcc] sm:$0xf]  ;;  %v3337_v11 = vld [vmem:[%s4439_s30 + $0xac] sm:$0xf0]  ;;  %v3053_v30 = vor.u32 %v3325_v55, %v3052_v54  ;;  %v3060_v59 = vld [vmem:[%s4439_s30 + $0x48] sm:$0xf] }
 0x612   : > { %v3101_v16 = vor.u32 %v3337_v11, %v3100_v9  ;;  %v3326_v60 = vld [vmem:[%s4439_s30 + $0x54] sm:$0xf0]  ;;  %v3324_v61 = vld [vmem:[%s4439_s30 + $0x4c] sm:$0xf]  ;;  %v3036_v48 = vld [vmem:[%s4439_s30 + $0x20] sm:$0xf] }
 0x613   : > { %v3061_v5 = vor.u32 %v3326_v60, %v3060_v59  ;;  %v3321_v62 = vld [vmem:[%s4439_s30 + $0x2c] sm:$0xf0]  ;;  %v3038_v1 = vld [vmem:[%s4439_s30 + $0x30] sm:$0xf0]  ;;  %v3320_v9 = vld [vmem:[%s4439_s30 + $0x2c] sm:$0xf] }
 0x614   : > { %1872 = vmatpush.bf16.msrb.mxu2 %v3121_v4  ;;  %v3037_v56 = vor.u32 %v3321_v62, %v3036_v48  ;;  %v3044_v4 = vld [vmem:[%s4439_s30 + $0x28] sm:$0xf]  ;;  %v3046_v11 = vld [vmem:[%s4439_s30 + $0x38] sm:$0xf0]  ;;  %v3549_v54 = vld [vmem:[%s5249_s19] ss:$0 sm:$0xff] }
 0x615   : > { %1585 = vmatpush.bf16.msrb.mxu0 %v3313_v12  ;;  %1886 = vmatpush.bf16.msrb.mxu3 %v3125_v6  ;;  %v3335_v12 = vld [vmem:[%s4439_s30 + $0xa4] sm:$0xf]  ;;  %v3322_v6 = vld [vmem:[%s4439_s30 + $0x34] sm:$0xf0] }
 0x61c   : > { %2997 = vmatmul.msk.bf16.vlgmr.msra.gmra.mxu0 %vm1105_vm8, %v1408_v7  ;;  %v3126_v7 = vld [vmem:[%s4439_s30 + $0xd8] sm:$0xf0] }
 0x61d   : > { %1899 = vmatpush.bf16.msra.mxu0 %v3145_v13  ;;  %v3129_v17 = vor.u32 %v3340_v41, %v3126_v7  ;;  %v3062_v13 = vld [vmem:[%s4439_s30 + $0x58] sm:$0xf0] }
 0x61e   : > { %v3065_v43 = vor.u32 %v3324_v61, %v3062_v13 }
 0x621   : > { %1900 = vmatpush.bf16.msra.mxu0 %v3129_v17  ;;  %v3045_v17 = vor.u32 %v3322_v6, %v3044_v4 }
 0x689   : > { %v1268_v19 = vpop.f32.mrf.mxu0 }
 0x691   : > { %v1270_v20 = vpop.f32.mrf.mxu0 }
 0x692   : > { %v1273_v44 = vpack.c.bf16 %v1270_v20, %v1268_v19  ;;  %v1553_v21 = vpop.f32.mrf.mxu3  ;;  %v3108_v19 = vld [vmem:[%s4439_s30 + $0xa8] sm:$0xf]  ;;  %v3338_v20 = vld [vmem:[%s4439_s30 + $0xb4] sm:$0xf0] }
 0x694   : > { %2986 = vmatmul.msk.bf16.vlgmr.msrb.gmra.mxu1 %vm1084_vm7, %v1273_v44  ;;  %v3105_v44 = vor.u32 %v3335_v12, %v3102_v18  ;;  %v3020_v12 = vld [vmem:[%s4439_s30] sm:$0xf]  ;;  %v3317_v18 = vld [vmem:[%s4439_s30 + $0xc] sm:$0xf0] }
 0x695   : > { %1857 = vmatpush.bf16.msrb.mxu1 %v3133_v57  ;;  %v3323_v57 = vld [vmem:[%s4439_s30 + $0x44] sm:$0xf] }
 0x696   : > { %1873 = vmatpush.bf16.msrb.mxu2 %v3105_v44  ;;  %v3057_v15 = vor.u32 %v3323_v57, %v3054_v58 }
 0x699   : > { %v1424_v23 = vpop.f32.mrf.mxu0  ;;  %1858 = vmatpush.bf16.msrb.mxu1 %v3117_v63  ;;  %v3319_v63 = vld [vmem:[%s4439_s30 + $0x24] sm:$0xf] }
 0x69a   : > { %v1555_v22 = vpop.f32.mrf.mxu3  ;;  %v3041_v7 = vor.u32 %v3319_v63, %v3038_v1 }
 0x69b   : > { %v1558_v24 = vpack.c.bf16 %v1555_v22, %v1553_v21  ;;  %v3109_v21 = vor.u32 %v3338_v20, %v3108_v19  ;;  %v3110_v22 = vld [vmem:[%s4439_s30 + $0xb8] sm:$0xf0]  ;;  %v3315_v19 = vld [vmem:[%s4439_s30 + $0x4] sm:$0xf]  ;;  %v3022_v20 = vld [vmem:[%s4439_s30 + $0x10] sm:$0xf0] }
 0x69d   : > { %3017 = vmatmul.msk.bf16.vlgmr.msrb.gmra.mxu0 %vm1084_vm7, %v1558_v24  ;;  %1859 = vmatpush.bf16.msrb.mxu1 %v3101_v16  ;;  %v3049_v16 = vor.u32 %v3320_v9, %v3046_v11 }
 0x69e   : > { %1887 = vmatpush.bf16.msrb.mxu3 %v3109_v21  ;;  %v3021_v21 = vor.u32 %v3317_v18, %v3020_v12 }
 0x6a1   : > { %v1426_v25 = vpop.f32.mrf.mxu0 }
 0x6a2   : > { %v1429_v26 = vpack.c.bf16 %v1426_v25, %v1424_v23  ;;  %v3336_v23 = vld [vmem:[%s4439_s30 + $0xac] sm:$0xf]  ;;  %v3084_v25 = vld [vmem:[%s4439_s30 + $0x80] sm:$0xf] }
 0x6a3   : > { %v3113_v24 = vor.u32 %v3336_v23, %v3110_v22  ;;  %v3025_v23 = vor.u32 %v3315_v19, %v3022_v20  ;;  %v3028_v22 = vld [vmem:[%s4439_s30 + $0x8] sm:$0xf] }
 0x6a4   : > { %3006 = vmatmul.msk.bf16.vlgmr.msra.gmra.mxu1 %vm1084_vm7, %v1429_v26  ;;  %v3333_v26 = vld [vmem:[%s4439_s30 + $0x8c] sm:$0xf0] }
 0x6a5   : > { %1901 = vmatpush.bf16.msra.mxu0 %v3113_v24  ;;  %v3318_v24 = vld [vmem:[%s4439_s30 + $0x14] sm:$0xf0] }
 0x711   : > { %v1302_v27 = vpop.f32.mrf.mxu1 }
 0x712   : > { %v1332_v29 = vadd.f32 %v4577_v8, %v1302_v27  ;;  %v3331_v27 = vld [vmem:[%s4439_s30 + $0x84] sm:$0xf] }
 0x719   : > { %v1304_v28 = vpop.f32.mrf.mxu1 }
 0x71a   : > { %v1587_v31 = vpop.f32.mrf.mxu0  ;;  %v1334_v37 = vadd.f32 %v4579_v14, %v1304_v28  ;;  %v3085_v28 = vor.u32 %v3333_v26, %v3084_v25  ;;  %v3029_v25 = vor.u32 %v3318_v24, %v3028_v22  ;;  %v3316_v26 = vld [vmem:[%s4439_s30 + $0xc] sm:$0xf] }
 0x71c   : > { %1860 = vmatpush.bf16.msrb.mxu1 %v3085_v28 }
 0x721   : > { %v1458_v32 = vpop.f32.mrf.mxu1 }
 0x722   : > { %v1463_v33 = vadd.f32 %v1458_v32, %v1332_v29  ;;  %v1589_v42 = vpop.f32.mrf.mxu0  ;;  %v3086_v29 = vld [vmem:[%s4439_s30 + $0x90] sm:$0xf0]  ;;  %v3334_v32 = vld [vmem:[%s4439_s30 + $0x94] sm:$0xf0] }
 0x724   : > { %v1592_v34 = vadd.f32 %v1587_v31, %v1463_v33  ;;  %v3092_v31 = vld [vmem:[%s4439_s30 + $0x88] sm:$0xf]  ;;  %v3089_v33 = vor.u32 %v3331_v27, %v3086_v29  ;;  %v3030_v27 = vld [vmem:[%s4439_s30 + $0x18] sm:$0xf0] }
 0x725   : > { %v3033_v28 = vor.u32 %v3316_v26, %v3030_v27 }
 0x726   : > { %v1594_v36 = vadd.f32 %v1592_v34, %v4472_v2  ;;  %v3093_v34 = vor.u32 %v3334_v32, %v3092_v31  ;;  %1874 = vmatpush.bf16.msrb.mxu2 %v3089_v33 }
 0x728   : > { %v4690_v38 = vadd.f32 %v3547_v35, %v1594_v36  ;;  %v3094_v36 = vld [vmem:[%s4439_s30 + $0x98] sm:$0xf0]  ;;  %1888 = vmatpush.bf16.msrb.mxu3 %v3093_v34 }
 0x729   : > { %v1460_v39 = vpop.f32.mrf.mxu1 }
 0x72a   : > { %v1464_v40 = vadd.f32 %v1460_v39, %v1334_v37  ;;  %1602 = vadd.xlane.f32.xlu0 %v4690_v38  ;;  %v3068_v39 = vld [vmem:[%s4439_s30 + $0x60] sm:$0xf] }
 0x72c   : > { %v1593_v8 = vadd.f32 %v1589_v42, %v1464_v40  ;;  %v3329_v40 = vld [vmem:[%s4439_s30 + $0x6c] sm:$0xf0]  ;;  %v3327_v42 = vld [vmem:[%s4439_s30 + $0x64] sm:$0xf] }
 0x72e   : > { %v1595_v45 = vadd.f32 %v1593_v8, %v4476_v3  ;;  %v3069_v8 = vor.u32 %v3329_v40, %v3068_v39 }
 0x730   : > { %v4694_v46 = vadd.f32 %v3547_v35, %v1595_v45  ;;  %v3332_v35 = vld [vmem:[%s4439_s30 + $0x8c] sm:$0xf]  ;;  %v3070_v45 = vld [vmem:[%s4439_s30 + $0x70] sm:$0xf0]  ;;  %1861 = vmatpush.bf16.msrb.mxu1 %v3069_v8 }
 0x731   : > { %v3097_v37 = vor.u32 %v3332_v35, %v3094_v36 }
 0x732   : > { %1604 = vadd.xlane.f32.xlu1 %v4694_v46 }
 0x733   : > { %1902 = vmatpush.bf16.msra.mxu0 %v3097_v37 }
 0x734   : > { %1862 = vmatpush.bf16.msrb.mxu1 %v3053_v30 }
 0x738   : > { %1863 = vmatpush.bf16.msrb.mxu1 %v3037_v56 }
 0x73c   : > { %1864 = vmatpush.bf16.msrb.mxu1 %v3021_v21 }
 0x79d   : > { %v1603_v2 = vpop.xlane.xlu0 %1602 }
 0x79e   : > { %v1606_v14 = vmul.f32 %v1603_v2, %v4479_v10  ;;  %v3076_v2 = vld [vmem:[%s4439_s30 + $0x68] sm:$0xf] }
 0x7a0   : > { %v4699_v47 = vsub.f32 %v4690_v38, %v1606_v14  ;;  %v3330_v14 = vld [vmem:[%s4439_s30 + $0x74] sm:$0xf0] }
 0x7a2   : > { %v1610_v49 = vmul.f32 %v4699_v47, %v4699_v47 }
 0x7a4   : > { %1612 = vadd.xlane.f32.xlu2 %v1610_v49  ;;  %v3073_v49 = vor.u32 %v3327_v42, %v3070_v45 }
 0x7a5   : > { %v1605_v3 = vpop.xlane.xlu1 %1604 }
 0x7a6   : > { %v1607_v50 = vmul.f32 %v1605_v3, %v4479_v10  ;;  %v3077_v3 = vor.u32 %v3330_v14, %v3076_v2  ;;  %1875 = vmatpush.bf16.msrb.mxu2 %v3073_v49  ;;  %v3548_v49 = vld [vmem:[%s5248_s20] ss:$0 sm:$0xff] }
 0x7a8   : > { %v4705_v51 = vsub.f32 %v4694_v46, %v1607_v50  ;;  %v3328_v50 = vld [vmem:[%s4439_s30 + $0x6c] sm:$0xf]  ;;  %1889 = vmatpush.bf16.msrb.mxu3 %v3077_v3 }
 0x7aa   : > { %v1611_v52 = vmul.f32 %v4705_v51, %v4705_v51  ;;  %1876 = vmatpush.bf16.msrb.mxu2 %v3057_v15 }
 0x7ac   : > { %1614 = vadd.xlane.f32.xlu0 %v1611_v52  ;;  %v3078_v52 = vld [vmem:[%s4439_s30 + $0x78] sm:$0xf0]  ;;  %1890 = vmatpush.bf16.msrb.mxu3 %v3061_v5 }
 0x7ad   : > { %v3081_v53 = vor.u32 %v3328_v50, %v3078_v52 }
 0x7ae   : > { %1877 = vmatpush.bf16.msrb.mxu2 %v3041_v7 }
 0x7af   : > { %1903 = vmatpush.bf16.msra.mxu0 %v3081_v53 }
 0x7b0   : > { %1891 = vmatpush.bf16.msrb.mxu3 %v3045_v17 }
 0x7b2   : > { %1878 = vmatpush.bf16.msrb.mxu2 %v3025_v23 }
 0x7b3   : > { %1904 = vmatpush.bf16.msra.mxu0 %v3065_v43 }
 0x7b4   : > { %1892 = vmatpush.bf16.msrb.mxu3 %v3029_v25 }
 0x7b7   : > { %1905 = vmatpush.bf16.msra.mxu0 %v3049_v16 }
 0x7bb   : > { %1906 = vmatpush.bf16.msra.mxu0 %v3033_v28 }
 0x817   : > { %v1613_v0 = vpop.xlane.xlu2 %1612 }
 0x818   : > { %v1616_v41 = vmul.f32 %v1613_v0, %v4479_v10 }
 0x81a   : > { %v1618_v44 = vadd.f32 1e-05, %v1616_v41 }
 0x81c   : > { %3589 = vrsqrt.f32 %v1618_v44  ;;  %vm1626_vm8 = vweird.f32 %v1618_v44 }
 0x81f   : > { %v1615_v29 = vpop.xlane.xlu0 %1614 }
 0x820   : > { %v1617_v31 = vmul.f32 %v1615_v29, %v4479_v10 }
 0x822   : > { %v3590_v32 = vpop.eup %3589  ;;  %v1619_v33 = vadd.f32 1e-05, %v1617_v31 }
 0x823   : > { %v1621_v34 = vmul.f32 %v3590_v32, %v1618_v44  ;;  %vm1627_vm7 = vweird.f32 %v3590_v32 }
 0x824   : > { %3591 = vrsqrt.f32 %v1619_v33  ;;  %vm1628_vm13 = vmor %vm1626_vm8, %vm1627_vm7  ;;  %vm1636_vm15 = vweird.f32 %v1619_v33 }
 0x825   : > { %v1622_v35 = vmul.f32 %v3590_v32, %v1621_v34 }
 0x827   : > { %v1623_v36 = vmul.f32 0.5, %v1622_v35 }
 0x829   : > { %v1624_v37 = vsub.f32 1.5, %v1623_v36 }
 0x82a   : > { %v3592_v39 = vpop.eup %3591 }
 0x82b   : > { %v1625_v40 = vmul.f32 %v3590_v32, %v1624_v37  ;;  %v1631_v42 = vmul.f32 %v3592_v39, %v1619_v33  ;;  %vm1637_vm14 = vweird.f32 %v3592_v39 }
 0x82c   : > { %vm1638_vm0 = vmor %vm1636_vm15, %vm1637_vm14 }
 0x82d   : > { %v1632_v8 = vmul.f32 %v3592_v39, %v1631_v42  ;;  %v1629_v45 = vsel %vm1628_vm13, %v3590_v32, %v1625_v40 }
 0x82e   : > { %v1640_v10 = vmul.f32 %v1629_v45, %v4699_v47  ;;  %v4782_v47 = vld [vmem:[%s4460_s14] sm:$0xf] }
 0x82f   : > { %v1633_v2 = vmul.f32 0.5, %v1632_v8  ;;  %v1689_v59 = vperm.slane %v4782_v47, 0  ;;  %v1692_v60 = vperm.slane %v4782_v47, 3  ;;  %v1690_v43 = vperm.slane %v4782_v47, 1 }
 0x830   : > { %v1646_v53 = vmul.f32 %v3548_v49, %v1640_v10  ;;  %v1691_v62 = vperm.slane %v4782_v47, 2 }
 0x831   : > { %v1634_v14 = vsub.f32 1.5, %v1633_v2 }
 0x832   : > { %v1652_v57 = vadd.f32 %v3549_v54, %v1646_v53 }
 0x833   : > { %v1635_v3 = vmul.f32 %v3592_v39, %v1634_v14 }
 0x835   : > { %v1639_v50 = vsel %vm1638_vm0, %v3592_v39, %v1635_v3 }
 0x836   : > { %v1641_v52 = vmul.f32 %v1639_v50, %v4705_v51 }
 0x838   : > { %v1647_v55 = vmul.f32 %v3548_v49, %v1641_v52 }
 0x83a   : > { %v1653_v30 = vadd.f32 %v3549_v54, %v1647_v55 }
 0x83c   : > { %v1654_v58 = vpack.c.bf16 %v1653_v30, %v1652_v57 }
 0x83e   : > { %1865 = vmatmul.bf16.vlgmr.msrb.gmra.mxu1 %v1654_v58  ;;  %1879 = vmatmul.bf16.vlgmr.msrb.gmra.mxu2 %v1654_v58 }
 0x83f   : > { %1893 = vmatmul.bf16.vlgmr.msrb.gmra.mxu3 %v1654_v58  ;;  %1907 = vmatmul.bf16.vlgmr.msra.gmra.mxu0 %v1654_v58 }
 0x8bb   : > { %v1866_v15 = vpop.f32.mrf.mxu1 }
 0x8bc   : > { %v4786_v5 = vadd.f32 %v1866_v15, %v1689_v59  ;;  %v1908_v51 = vpop.f32.mrf.mxu0 }
 0x8bd   : > { %v4788_v61 = vadd.f32 %v1908_v51, %v1692_v60 }
 0x8be   : > { %v4791_v13 = vmul.f32 0.70710677, %v4786_v5 }
 0x8bf   : > { %v4795_v48 = vmul.f32 0.70710677, %v4788_v61 }
 0x8c0   : > { %v4799_v63 = vand.u32 2147483647, %v4791_v13  ;;  %vm1929_vm8 = vcmp.ge.f32.partialorder %v4791_v13, 0.0 }
 0x8c1   : > { %v4802_v0 = vand.u32 2147483647, %v4795_v48  ;;  %v1880_v56 = vpop.f32.mrf.mxu2 }
 0x8c2   : > { %v1953_v1 = vmul.f32 0.3275911, %v4799_v63  ;;  %v4807_v4 = vadd.f32 %v1880_v56, %v1690_v43  ;;  %v1894_v6 = vpop.f32.mrf.mxu3 }
 0x8c3   : > { %v1956_v41 = vmul.f32 0.3275911, %v4802_v0  ;;  %v4812_v7 = vadd.f32 %v1894_v6, %v1691_v62  ;;  %v1868_v22 = vpop.f32.mrf.mxu1 }
 0x8c4   : > { %v1961_v17 = vadd.f32 1.0, %v1953_v1  ;;  %v4815_v11 = vmul.f32 0.70710677, %v4807_v4  ;;  %v1910_v26 = vpop.f32.mrf.mxu0  ;;  %v4833_v33 = vadd.f32 %v1868_v22, %v1689_v59 }
 0x8c5   : > { %v1964_v9 = vadd.f32 1.0, %v1956_v41  ;;  %v4818_v12 = vmul.f32 0.70710677, %v4812_v7  ;;  %v4835_v36 = vadd.f32 %v1910_v26, %v1692_v60 }
 0x8c6   : > { %3593 = vrcp.f32 %v1961_v17  ;;  %v4821_v16 = vand.u32 2147483647, %v4815_v11  ;;  %v1978_v28 = vand.u32 2147483647, %v1961_v17  ;;  %v1980_v29 = vand.u32 2147483648, %v1961_v17 }
 0x8c7   : > { %3595 = vrcp.f32 %v1964_v9  ;;  %v4825_v19 = vand.u32 2147483647, %v4818_v12  ;;  %v2025_v35 = vand.u32 2147483648, %v1964_v9  ;;  %v2023_v39 = vand.u32 2147483647, %v1964_v9 }
 0x8c8   : > { %v1954_v18 = vmul.f32 0.3275911, %v4821_v16  ;;  %vm1974_vm3 = vweird.f32 %v1961_v17  ;;  %v1981_v42 = vor.u32 1.1754944e-38, %v1980_v29  ;;  %vm2019_vm5 = vweird.f32 %v1964_v9 }
 0x8c9   : > { %v1955_v25 = vmul.f32 0.3275911, %v4825_v19  ;;  %v4839_v45 = vmul.f32 0.70710677, %v4833_v33  ;;  %vm1979_vm6 = vcmp.eq.f32.partialorder %v1978_v28, 8.507059e+37  ;;  %v2026_v10 = vor.u32 1.1754944e-38, %v2025_v35 }
 0x8ca   : > { %v4827_v23 = vadd.f32 1.0, %v1954_v18  ;;  %v4842_v49 = vmul.f32 0.70710677, %v4835_v36  ;;  %vm2024_vm10 = vcmp.eq.f32.partialorder %v2023_v39, 8.507059e+37  ;;  %v4885_v39 = vmul.f32 0.5, %v4788_v61 }
 0x8cb   : > { %v4831_v32 = vadd.f32 1.0, %v1955_v25  ;;  %v4852_v30 = vand.u32 2147483647, %v4839_v45 }
 0x8cc   : > { %v3594_v20 = vpop.eup %3593  ;;  %3597 = vrcp.f32 %v4827_v23  ;;  %v4857_v60 = vand.u32 2147483647, %v4842_v49  ;;  %vm1989_vm12 = vweird.f32 %v4827_v23  ;;  %v1993_v25 = vand.u32 2147483647, %v4827_v23 }
 0x8cd   : > { %v3596_v44 = vpop.eup %3595  ;;  %v1970_v21 = vmul.f32 %v3594_v20, %v1961_v17  ;;  %vm1975_vm1 = vweird.f32 %v3594_v20  ;;  %3599 = vrcp.f32 %v4831_v32  ;;  %v1957_v1 = vmul.f32 0.3275911, %v4852_v30 }
 0x8ce   : > { %v2015_v24 = vmul.f32 %v3596_v44, %v1964_v9  ;;  %vm2020_vm2 = vweird.f32 %v3596_v44  ;;  %vm1976_vm4 = vmor %vm1974_vm3, %vm1975_vm1  ;;  %v1960_v41 = vmul.f32 0.3275911, %v4857_v60  ;;  %vm1994_vm13 = vcmp.eq.f32.partialorder %v1993_v25, 8.507059e+37 }
 0x8cf   : > { %v1971_v27 = vsub.f32 1.0, %v1970_v21  ;;  %vm2021_vm9 = vmor %vm2019_vm5, %vm2020_vm2  ;;  %v4864_v18 = vadd.f32 1.0, %v1957_v1  ;;  %v1995_v21 = vand.u32 2147483648, %v4827_v23  ;;  %v2008_v13 = vand.u32 2147483647, %v4831_v32 }
 0x8d0   : > { %v2016_v31 = vsub.f32 1.0, %v2015_v24  ;;  %v4869_v22 = vadd.f32 1.0, %v1960_v41  ;;  %v2164_v24 = vsub.f32 0.0, %v4802_v0  ;;  %vm2004_vm15 = vweird.f32 %v4831_v32 }
 0x8d1   : > { %v1972_v34 = vmul.f32 %v3594_v20, %v1971_v27  ;;  %3601 = vrcp.f32 %v4864_v18  ;;  %vm2009_vm1 = vcmp.eq.f32.partialorder %v2008_v13, 8.507059e+37  ;;  %vm2034_vm3 = vweird.f32 %v4864_v18 }
 0x8d2   : > { %v2017_v37 = vmul.f32 %v3596_v44, %v2016_v31  ;;  %v3598_v2 = vpop.eup %3597  ;;  %3603 = vrcp.f32 %v4869_v22  ;;  %v2172_v35 = vmul.f32 %v2164_v24, %v4802_v0  ;;  %v2010_v0 = vand.u32 2147483648, %v4831_v32 }
 0x8d3   : > { %v1973_v40 = vadd.f32 %v3594_v20, %v1972_v34  ;;  %v1985_v52 = vmul.f32 %v3598_v2, %v4827_v23  ;;  %v4854_v58 = vpop.eup %3599  ;;  %vm1990_vm11 = vweird.f32 %v3598_v2  ;;  %v1996_v34 = vor.u32 1.1754944e-38, %v1995_v21 }
 0x8d4   : > { %v2018_v8 = vadd.f32 %v3596_v44, %v2017_v37  ;;  %v2000_v56 = vmul.f32 %v4854_v58, %v4831_v32  ;;  %vm1991_vm7 = vmor %vm1989_vm12, %vm1990_vm11  ;;  %v4881_v23 = vmul.f32 0.5, %v4786_v5  ;;  %vm2005_vm14 = vweird.f32 %v4854_v58 }
 0x8d5   : > { %v1977_v14 = vsel %vm1976_vm4, %v3594_v20, %v1973_v40  ;;  %v1986_v57 = vsub.f32 1.0, %v1985_v52  ;;  %v2161_v20 = vsub.f32 0.0, %v4799_v63  ;;  %v4900_v52 = vmul.f32 1.442695, %v2172_v35  ;;  %vm4911_vm0 = vmor %vm2004_vm15, %vm2005_vm14 }
 0x8d6   : > { %v4844_v3 = vsel %vm1979_vm6, %v1981_v42, %v1977_v14  ;;  %v2022_v50 = vsel %vm2021_vm9, %v3596_v44, %v2018_v8  ;;  %v2001_v9 = vsub.f32 1.0, %v2000_v56  ;;  %v1882_v42 = vpop.f32.mrf.mxu2  ;;  %v2040_v56 = vand.u32 2147483648, %v4864_v18 }
 0x8d7   : > { %v2089_v53 = vmul.f32 1.0614054, %v4844_v3  ;;  %v4848_v54 = vsel %vm2024_vm10, %v2026_v10, %v2022_v50  ;;  %v1987_v51 = vmul.f32 %v3598_v2, %v1986_v57  ;;  %v2169_v29 = vmul.f32 %v2161_v20, %v4799_v63  ;;  %v3602_v8 = vpop.eup %3601  ;;  %v3378_v20 = vld [vmem:[%s4442_s18 + $0xf8] sm:$0xff] }
 0x8d8   : > { %v2092_v55 = vmul.f32 1.0614054, %v4848_v54  ;;  %v2002_v28 = vmul.f32 %v4854_v58, %v2001_v9  ;;  %v2030_v10 = vmul.f32 %v3602_v8, %v4864_v18  ;;  %v4898_v50 = vpop.eup %3603  ;;  %v2011_v1 = vor.u32 1.1754944e-38, %v2010_v0  ;;  %v3354_v9 = vld [vmem:[%s4442_s18 + $0x38] sm:$0xff]  ;;  %2539 = vmatpush.bf16.msrb.mxu0 %v3378_v20 }
 0x8d9   : > { %v2097_v59 = vadd.f32 -1.4531521, %v2089_v53  ;;  %v1988_v17 = vadd.f32 %v3598_v2, %v1987_v51  ;;  %v2177_v14 = vmul.f32 1.442695, %v2169_v29  ;;  %vm2035_vm2 = vweird.f32 %v3602_v8  ;;  %2497 = vmatpush.bf16.msra.mxu1 %v3354_v9 }
 0x8da   : > { %v2100_v15 = vadd.f32 -1.4531521, %v2092_v55  ;;  %v2003_v63 = vadd.f32 %v4854_v58, %v2002_v28  ;;  %v4906_v55 = vadd.f32 %v1882_v42, %v1690_v43  ;;  %v2031_v51 = vsub.f32 1.0, %v2030_v10  ;;  %vm2036_vm5 = vmor %vm2034_vm3, %vm2035_vm2  ;;  %v3377_v42 = vld [vmem:[%s4442_s18 + $0xf0] sm:$0xff] }
 0x8db   : > { %v2105_v6 = vmul.f32 %v2097_v59, %v4844_v3  ;;  %v1992_v27 = vsel %vm1991_vm7, %v3598_v2, %v1988_v17  ;;  %v4081_v2 = vmov -1.0   ;;  %v2162_v59 = vsub.f32 0.0, %v4821_v16 }
 0x8dc   : > { %v2108_v44 = vmul.f32 %v2100_v15, %v4848_v54  ;;  %v4887_v40 = vsel %vm1994_vm13, %v1996_v34, %v1992_v27  ;;  %v4894_v5 = vsel %vm1929_vm8, 1.0, %v4081_v2  ;;  %v2007_v32 = vsel %vm4911_vm0, %v4854_v58, %v2003_v63  ;;  %2540 = vmatpush.bf16.msrb.mxu0 %v3377_v42  ;;  %v3370_v15 = vld [vmem:[%s4442_s18 + $0xb8] sm:$0xff] }
 0x8dd   : > { %v2113_v26 = vadd.f32 1.4214138, %v2105_v6  ;;  %v2090_v53 = vmul.f32 1.0614054, %v4887_v40  ;;  %v2075_v43 = vmul.f32 %v4898_v50, %v4869_v22  ;;  %v2032_v41 = vmul.f32 %v3602_v8, %v2031_v51  ;;  %2525 = vmatpush.bf16.msra.mxu3 %v3370_v15 }
 0x8de   : > { %v2116_v31 = vadd.f32 1.4214138, %v2108_v44  ;;  %v2038_v17 = vand.u32 2147483647, %v4864_v18  ;;  %v4926_v24 = vmul.f32 0.70710677, %v4906_v55  ;;  %v4930_v25 = vsel %vm2009_vm1, %v2011_v1, %v2007_v32 }
 0x8df   : > { %v2121_v37 = vmul.f32 %v2113_v26, %v4844_v3  ;;  %v2098_v44 = vadd.f32 -1.4531521, %v2090_v53  ;;  %v2076_v21 = vsub.f32 1.0, %v2075_v43  ;;  %vm1932_vm4 = vcmp.ge.f32.partialorder %v4795_v48, 0.0  ;;  %v3360_v48 = vld [vmem:[%s4442_s18 + $0x68] sm:$0xff] }
 0x8e0   : > { %v2124_v61 = vmul.f32 %v2116_v31, %v4848_v54  ;;  %v2033_v26 = vadd.f32 %v3602_v8, %v2032_v41  ;;  %v2041_v27 = vor.u32 1.1754944e-38, %v2040_v56  ;;  %vm2080_vm6 = vweird.f32 %v4898_v50  ;;  %v3352_v41 = vld [vmem:[%s4442_s18 + $0x28] sm:$0xff] }
 0x8e1   : > { %v2129_v57 = vadd.f32 -0.28449672, %v2121_v37  ;;  %v2077_v18 = vmul.f32 %v4898_v50, %v2076_v21  ;;  %v2085_v28 = vand.u32 2147483648, %v4869_v22  ;;  %v4937_v29 = vand.u32 2147483647, %v4926_v24  ;;  %v3353_v37 = vld [vmem:[%s4442_s18 + $0x30] sm:$0xff] }
 0x8e2   : > { %v2132_v6 = vadd.f32 -0.28449672, %v2124_v61  ;;  %v2037_v31 = vsel %vm2036_vm5, %v3602_v8, %v2033_v26  ;;  %vm2039_vm9 = vcmp.eq.f32.partialorder %v2038_v17, 8.507059e+37  ;;  %v2165_v34 = vsub.f32 0.0, %v4852_v30  ;;  %2498 = vmatpush.bf16.msra.mxu1 %v3353_v37  ;;  %v3376_v17 = vld [vmem:[%s4442_s18 + $0xe8] sm:$0xff]  ;;  %v3361_v26 = vld [vmem:[%s4442_s18 + $0x70] sm:$0xff] }
 0x8e3   : > { %v2137_v58 = vmul.f32 %v2129_v57, %v4844_v3  ;;  %v2083_v35 = vand.u32 2147483647, %v4869_v22  ;;  %v4944_v13 = vsel %vm2039_vm9, %v2041_v27, %v2037_v31  ;;  %v2078_v0 = vadd.f32 %v4898_v50, %v2077_v18  ;;  %v3362_v57 = vld [vmem:[%s4442_s18 + $0x78] sm:$0xff]  ;;  %2541 = vmatpush.bf16.msrb.mxu0 %v3376_v17  ;;  %v3369_v27 = vld [vmem:[%s4442_s18 + $0xb0] sm:$0xff] }
 0x8e4   : > { %v2140_v63 = vmul.f32 %v2132_v6, %v4848_v54  ;;  %vm2079_vm10 = vweird.f32 %v4869_v22  ;;  %v2106_v61 = vmul.f32 %v2098_v44, %v4887_v40  ;;  %v2091_v8 = vmul.f32 1.0614054, %v4930_v25  ;;  %v1896_v6 = vpop.f32.mrf.mxu3  ;;  %2511 = vmatpush.bf16.msra.mxu2 %v3362_v57  ;;  %2526 = vmatpush.bf16.msra.mxu3 %v3369_v27 }
 0x8e5   : > { %v2093_v10 = vmul.f32 1.0614054, %v4944_v13  ;;  %vm4953_vm11 = vmor %vm2079_vm10, %vm2080_vm6  ;;  %v2145_v51 = vadd.f32 0.2548296, %v2137_v58  ;;  %v2086_v56 = vor.u32 1.1754944e-38, %v2085_v28  ;;  %3605 = vpow2.f32 %v2177_v14 }
 0x8e6   : > { %v2082_v22 = vsel %vm4953_vm11, %v4898_v50, %v2078_v0  ;;  %v1958_v32 = vmul.f32 0.3275911, %v4937_v29  ;;  %v2173_v43 = vmul.f32 %v2165_v34, %v4852_v30  ;;  %vm2084_vm12 = vcmp.eq.f32.partialorder %v2083_v35, 8.507059e+37  ;;  %2499 = vmatpush.bf16.msra.mxu1 %v3352_v41  ;;  %v3351_v34 = vld [vmem:[%s4442_s18 + $0x20] sm:$0xff] }
 0x8e7   : > { %v2101_v1 = vadd.f32 -1.4531521, %v2093_v10  ;;  %v2148_v9 = vadd.f32 0.2548296, %v2140_v63  ;;  %v4966_v20 = vsel %vm2084_vm12, %v2086_v56, %v2082_v22  ;;  %v2168_v50 = vsub.f32 0.0, %v4857_v60  ;;  %v3375_v35 = vld [vmem:[%s4442_s18 + $0xe0] sm:$0xff] }
 0x8e8   : > { %v4969_v44 = vadd.f32 1.0, %v1958_v32  ;;  %v2114_v21 = vadd.f32 1.4214138, %v2106_v61  ;;  %v2170_v30 = vmul.f32 %v2162_v59, %v4821_v16  ;;  %v2096_v58 = vmul.f32 1.0614054, %v4966_v20  ;;  %2512 = vmatpush.bf16.msra.mxu2 %v3361_v26  ;;  %2542 = vmatpush.bf16.msrb.mxu0 %v3375_v35  ;;  %v3350_v22 = vld [vmem:[%s4442_s18 + $0x18] sm:$0xff] }
 0x8e9   : > { %v2109_v14 = vmul.f32 %v2101_v1, %v4944_v13  ;;  %v2153_v18 = vmul.f32 %v2145_v51, %v4844_v3  ;;  %v2099_v28 = vadd.f32 -1.4531521, %v2091_v8  ;;  %v4982_v31 = vadd.f32 %v1896_v6, %v1691_v62  ;;  %v3368_v8 = vld [vmem:[%s4442_s18 + $0xa8] sm:$0xff]  ;;  %v3374_v56 = vld [vmem:[%s4442_s18 + $0xd8] sm:$0xff] }
 0x8ea   : > { %3607 = vrcp.f32 %v4969_v44  ;;  %v2104_v59 = vadd.f32 -1.4531521, %v2096_v58  ;;  %v4990_v3 = vsel %vm1932_vm4, 1.0, %v4081_v2  ;;  %v2163_v37 = vsub.f32 0.0, %v4825_v19  ;;  %2500 = vmatpush.bf16.msra.mxu1 %v3351_v34  ;;  %2527 = vmatpush.bf16.msra.mxu3 %v3368_v8 }
 0x8eb   : > { %3609 = vpow2.f32 %v4900_v52  ;;  %v2117_v16 = vadd.f32 1.4214138, %v2109_v14  ;;  %v2185_v47 = vmul.f32 1.442695, %v2173_v43  ;;  %v2176_v62 = vmul.f32 %v2168_v50, %v4857_v60  ;;  %v3606_v42 = vpop.eup %3605  ;;  %v3359_v50 = vld [vmem:[%s4442_s18 + $0x60] sm:$0xff] }
 0x8ec   : > { %v2122_v52 = vmul.f32 %v2114_v21, %v4887_v40  ;;  %v4995_v63 = vmul.f32 1.442695, %v2170_v30  ;;  %v2112_v61 = vmul.f32 %v2104_v59, %v4966_v20  ;;  %v2193_v10 = vmul.f32 %v3606_v42, %v2153_v18  ;;  %2513 = vmatpush.bf16.msra.mxu2 %v3360_v48  ;;  %2543 = vmatpush.bf16.msrb.mxu0 %v3374_v56  ;;  %v3367_v21 = vld [vmem:[%s4442_s18 + $0xa0] sm:$0xff] }
 0x8ed   : > { %v2125_v0 = vmul.f32 %v2117_v16, %v4944_v13  ;;  %v2156_v53 = vmul.f32 %v2148_v9, %v4848_v54  ;;  %v2107_v60 = vmul.f32 %v2099_v28, %v4930_v25  ;;  %v5004_v57 = vmul.f32 0.70710677, %v4982_v31  ;;  %v3349_v16 = vld [vmem:[%s4442_s18 + $0x10] sm:$0xff] }
 0x8ee   : > { %v2120_v51 = vadd.f32 1.4214138, %v2112_v61  ;;  %vm1933_vm7 = vcmp.ge.f32.partialorder %v4839_v45, 0.0  ;;  %3611 = vpow2.f32 %v2185_v47  ;;  %v2191_v1 = vmul.f32 1.442695, %v2176_v62  ;;  %2501 = vmatpush.bf16.msra.mxu1 %v3350_v22  ;;  %2528 = vmatpush.bf16.msra.mxu3 %v3367_v21  ;;  %v3373_v47 = vld [vmem:[%s4442_s18 + $0xd0] sm:$0xff] }
 0x8ef   : > { %v2133_v15 = vadd.f32 -0.28449672, %v2125_v0  ;;  %v5012_v54 = vand.u32 2147483647, %v5004_v57  ;;  %v2130_v6 = vadd.f32 -0.28449672, %v2122_v52  ;;  %vm2049_vm13 = vweird.f32 %v4969_v44 }
 0x8f0   : > { %v5008_v32 = vpop.eup %3607  ;;  %v2128_v17 = vmul.f32 %v2120_v51, %v4966_v20  ;;  %v2201_v30 = vsub.f32 1.0, %v2193_v10  ;;  %v2115_v58 = vadd.f32 1.4214138, %v2107_v60  ;;  %2514 = vmatpush.bf16.msra.mxu2 %v3359_v50  ;;  %3613 = vpow2.f32 %v2191_v1  ;;  %v3358_v0 = vld [vmem:[%s4442_s18 + $0x58] sm:$0xff]  ;;  %2544 = vmatpush.bf16.msrb.mxu0 %v3373_v47  ;;  %v3348_v51 = vld [vmem:[%s4442_s18 + $0x8] sm:$0xff] }
 0x8f1   : > { %v3610_v43 = vpop.eup %3609  ;;  %v2141_v41 = vmul.f32 %v2133_v15, %v4944_v13  ;;  %v2045_v9 = vmul.f32 %v5008_v32, %v4969_v44  ;;  %v1959_v26 = vmul.f32 0.3275911, %v5012_v54  ;;  %v2053_v59 = vand.u32 2147483647, %v4969_v44  ;;  %v3366_v61 = vld [vmem:[%s4442_s18 + $0x98] sm:$0xff] }
 0x8f2   : > { %v2196_v14 = vmul.f32 %v3610_v43, %v2156_v53  ;;  %v2136_v18 = vadd.f32 -0.28449672, %v2128_v17  ;;  %v2055_v34 = vand.u32 2147483648, %v4969_v44  ;;  %vm2050_vm8 = vweird.f32 %v5008_v32  ;;  %2502 = vmatpush.bf16.msra.mxu1 %v3349_v16  ;;  %2529 = vmatpush.bf16.msra.mxu3 %v3366_v61  ;;  %v3365_v17 = vld [vmem:[%s4442_s18 + $0x90] sm:$0xff] }
 0x8f3   : > { %v2149_v27 = vadd.f32 0.2548296, %v2141_v41  ;;  %v2046_v28 = vsub.f32 1.0, %v2045_v9  ;;  %v5024_v35 = vadd.f32 1.0, %v1959_v26  ;;  %v2209_v8 = vmul.f32 %v2201_v30, %v4894_v5  ;;  %v3372_v5 = vld [vmem:[%s4442_s18 + $0xc8] sm:$0xff]  ;;  %vm2051_vm15 = vmor %vm2049_vm13, %vm2050_vm8  ;;  %v3357_v41 = vld [vmem:[%s4442_s18 + $0x50] sm:$0xff] }
 0x8f4   : > { %v2144_v42 = vmul.f32 %v2136_v18, %v4966_v20  ;;  %v3612_v48 = vpop.eup %3611  ;;  %v2204_v10 = vsub.f32 1.0, %v2196_v14  ;;  %v1941_v53 = vsel %vm1933_vm7, 1.0, %v4081_v2  ;;  %2515 = vmatpush.bf16.msra.mxu2 %v3358_v0  ;;  %v2138_v22 = vmul.f32 %v2130_v6, %v4887_v40  ;;  %2545 = vmatpush.bf16.msrb.mxu0 %v3372_v5  ;;  %v3347_v26 = vld [vmem:[%s4442_s18] sm:$0xff] }
 0x8f5   : > { %v2157_v62 = vmul.f32 %v2149_v27, %v4944_v13  ;;  %v2047_v52 = vmul.f32 %v5008_v32, %v2046_v28  ;;  %3615 = vrcp.f32 %v5024_v35  ;;  %v2123_v45 = vmul.f32 %v2115_v58, %v4930_v25  ;;  %v3371_v27 = vld [vmem:[%s4442_s18 + $0xc0] sm:$0xff] }
 0x8f6   : > { %v2152_v60 = vadd.f32 0.2548296, %v2144_v42  ;;  %vm1936_vm14 = vcmp.ge.f32.partialorder %v4842_v49, 0.0  ;;  %v2056_v56 = vor.u32 1.1754944e-38, %v2055_v34  ;;  %vm2054_vm0 = vcmp.eq.f32.partialorder %v2053_v59, 8.507059e+37  ;;  %2503 = vmatpush.bf16.msra.mxu1 %v3348_v51  ;;  %v3614_v6 = vpop.eup %3613  ;;  %2530 = vmatpush.bf16.msra.mxu3 %v3365_v17  ;;  %v3364_v42 = vld [vmem:[%s4442_s18 + $0x88] sm:$0xff] }
 0x8f7   : > { %v2197_v13 = vmul.f32 %v3612_v48, %v2157_v62  ;;  %v2048_v15 = vadd.f32 %v5008_v32, %v2047_v52  ;;  %v2217_v9 = vadd.f32 1.0, %v2209_v8  ;;  %v2212_v50 = vmul.f32 %v2204_v10, %v4990_v3  ;;  %v3356_v62 = vld [vmem:[%s4442_s18 + $0x48] sm:$0xff]  ;;  %v3355_v51 = vld [vmem:[%s4442_s18 + $0x40] sm:$0xff] }
 0x8f8   : > { %v2160_v43 = vmul.f32 %v2152_v60, %v4966_v20  ;;  %v2166_v30 = vsub.f32 0.0, %v4937_v29  ;;  %v1917_v14 = vmul.f32 0.5, %v4833_v33  ;;  %2516 = vmatpush.bf16.msra.mxu2 %v3357_v41  ;;  %v2146_v28 = vadd.f32 0.2548296, %v2138_v22  ;;  %2546 = vmatpush.bf16.msrb.mxu0 %v3371_v27  ;;  %v3363_v5 = vld [vmem:[%s4442_s18 + $0x80] sm:$0xff]  ;;  %s5256_s18 = sld [smem:[#allocation49_spill]] }
 0x8f9   : > { %v2205_v1 = vsub.f32 1.0, %v2197_v13  ;;  %v2052_v44 = vsel %vm2051_vm15, %v5008_v32, %v2048_v15  ;;  %3617 = vpow2.f32 %v4995_v63  ;;  %v1920_v3 = vmul.f32 0.5, %v4835_v36 }
 0x8fa   : > { %v5052_v21 = vsel %vm2054_vm0, %v2056_v56, %v2052_v44  ;;  %v2200_v58 = vmul.f32 %v3614_v6, %v2160_v43  ;;  %v1944_v33 = vsel %vm1936_vm14, 1.0, %v4081_v2  ;;  %2504 = vmatpush.bf16.msra.mxu1 %v3347_v26  ;;  %v2225_v52 = vmul.f32 %v2217_v9, %v4881_v23  ;;  %2531 = vmatpush.bf16.msra.mxu3 %v3364_v42 }
 0x8fb   : > { %v2213_v20 = vmul.f32 %v2205_v1, %v1941_v53  ;;  %v2094_v32 = vmul.f32 1.0614054, %v5052_v21  ;;  %v3616_v18 = vpop.eup %3615  ;;  %v2220_v0 = vadd.f32 1.0, %v2212_v50  ;;  %v2131_v61 = vadd.f32 -0.28449672, %v2123_v45 }
 0x8fc   : > { %v2208_v59 = vsub.f32 1.0, %v2200_v58  ;;  %v2060_v47 = vmul.f32 %v3616_v18, %v5024_v35  ;;  %v2174_v63 = vmul.f32 %v2166_v30, %v4937_v29  ;;  %2517 = vmatpush.bf16.msra.mxu2 %v3356_v62  ;;  %v2154_v10 = vmul.f32 %v2146_v28, %v4887_v40 }
 0x8fd   : > { %v2221_v16 = vadd.f32 1.0, %v2213_v20  ;;  %v2102_v34 = vadd.f32 -1.4531521, %v2094_v32  ;;  %vm2065_vm1 = vweird.f32 %v3616_v18  ;;  %v2068_v53 = vand.u32 2147483647, %v5024_v35 }
 0x8fe   : > { %v2216_v49 = vmul.f32 %v2208_v59, %v1944_v33  ;;  %v2061_v8 = vsub.f32 1.0, %v2060_v47  ;;  %v2070_v23 = vand.u32 2147483648, %v5024_v35  ;;  %v2228_v45 = vmul.f32 %v2220_v0, %v4885_v39  ;;  %2532 = vmatpush.bf16.msra.mxu3 %v3363_v5  ;;  %s2569_s4 = scalar_lea.hbm %s5256_s18, %s3379_s0  ;;  %s3945_s2 = scalar_lea.hbm %s5256_s18, 32 }
 0x8ff   : > { %v2229_v36 = vmul.f32 %v2221_v16, %v1917_v14  ;;  %v2110_v48 = vmul.f32 %v2102_v34, %v5052_v21  ;;  %v3618_v22 = vpop.eup %3617  ;;  %v2171_v56 = vmul.f32 %v2163_v37, %v4825_v19  ;;  %v2187_v1 = vmul.f32 1.442695, %v2174_v63  ;;  %s2572_s11 = sshll.u32 %s2569_s4, 4  ;;  %s2573_s11 = int_to_ptr.hbm [resolvable:$true] %s2572_s11 }
 0x900   : > { %v2224_v60 = vadd.f32 1.0, %v2216_v49  ;;  %v2062_v15 = vmul.f32 %v3616_v18, %v2061_v8  ;;  %vm2064_vm2 = vweird.f32 %v5024_v35  ;;  %2518 = vmatpush.bf16.msra.mxu2 %v3355_v51  ;;  %v2194_v41 = vmul.f32 %v3618_v22, %v2154_v10  ;;  %s3939_s8 = sshra.s32 %s2573_s11, 4  ;;  %s3940_s8 = int_to_ptr.hbm [resolvable:$true] %s3939_s8 }
 0x901   : > { %v2233_v13 = vpack.c.bf16 %v2229_v36, %v2225_v52  ;;  %v2118_v29 = vadd.f32 1.4214138, %v2110_v48  ;;  %v2139_v17 = vmul.f32 %v2131_v61, %v4930_v25  ;;  %vm2066_vm3 = vmor %vm2064_vm2, %vm2065_vm1  ;;  %v2071_v6 = vor.u32 1.1754944e-38, %v2070_v23  ;;  %s3941_s27 = scalar_lea.hbm %s3940_s8, 16  ;;  %p3946_p3 = scmp.lt.s32.totalorder %s3940_s8, %s5256_s18 }
 0x902   : > { %v2232_v40 = vmul.f32 %v2224_v60, %v1920_v3  ;;  %v2063_v44 = vadd.f32 %v3616_v18, %v2062_v15  ;;  %vm2069_vm4 = vcmp.eq.f32.partialorder %v2068_v53, 8.507059e+37  ;;  %v2181_v19 = vmul.f32 1.442695, %v2171_v56  ;;  %p3942_p10 = scmp.ne.s32.totalorder %s3940_s8, %s3941_s27  ;;  %p3947_p0 = scmp.lt.s32.totalorder %s3945_s2, %s3941_s27 }
 0x903   : > { %v2126_v43 = vmul.f32 %v2118_v29, %v5052_v21  ;;  %2505 = vmatmul.bf16.vlgmr.msra.gmra.mxu1 %v2233_v13  ;;  %3619 = vpow2.f32 %v2187_v1  ;;  %v2167_v30 = vsub.f32 0.0, %v5012_v54  ;;  %v2147_v20 = vadd.f32 0.2548296, %v2139_v17 }
 0x904   : > { %v2236_v39 = vpack.c.bf16 %v2232_v40, %v2228_v45  ;;  %v2067_v50 = vsel %vm2066_vm3, %v3616_v18, %v2063_v44  ;;  %vm1930_vm5 = vcmp.ge.f32.partialorder %v4815_v11, 0.0  ;;  %v2202_v58 = vsub.f32 1.0, %v2194_v41  ;;  %p3943_p11 = pnand %p3942_p10, %p4324_p12  ;;  %p3948_p5 = por %p3947_p0, %p3946_p3 }
 0x905   : > { %v2134_v9 = vadd.f32 -0.28449672, %v2126_v43  ;;  %v2072_v37 = vsel %vm2069_vm4, %v2071_v6, %v2067_v50  ;;  %3621 = vpow2.f32 %v2181_v19  ;;  %v2175_v27 = vmul.f32 %v2167_v30, %v5012_v54 }
 0x906   : > { %v2095_v14 = vmul.f32 1.0614054, %v2072_v37  ;;  %2547 = vmatmul.bf16.vlgmr.msrb.gmra.mxu0 %v2236_v39  ;;  %v1938_v33 = vsel %vm1930_vm5, 1.0, %v4081_v2  ;;  %vm1934_vm6 = vcmp.ge.f32.partialorder %v4926_v24, 0.0  ;;  %v2155_v59 = vmul.f32 %v2147_v20, %v4930_v25  ;;  %p3944_p1 = pneg %p3943_p11 }
 0x907   : > { %v2142_v35 = vmul.f32 %v2134_v9, %v5052_v21  ;;  %v2210_v16 = vmul.f32 %v2202_v58, %v1938_v33  ;;  %v2189_v11 = vmul.f32 1.442695, %v2175_v27  ;;  %v1942_v0 = vsel %vm1934_vm6, 1.0, %v4081_v2 }
 0x908   : > { %v2103_v26 = vadd.f32 -1.4531521, %v2095_v14  ;;  %v1914_v36 = vmul.f32 0.5, %v4807_v4  ;;  %v1918_v24 = vmul.f32 0.5, %v4906_v55  ;;  %vm1931_vm9 = vcmp.ge.f32.partialorder %v4818_v12, 0.0  ;;  %p3949_p6 = pnand %p3948_p5, %p3944_p1 }
 0x909   : > { %v2150_v32 = vadd.f32 0.2548296, %v2142_v35  ;;  %v3620_v3 = vpop.eup %3619  ;;  %v2218_v54 = vadd.f32 1.0, %v2210_v16  ;;  %3623 = vpow2.f32 %v2189_v11  ;;  %v1939_v29 = vsel %vm1931_vm9, 1.0, %v4081_v2 }
 0x90a   : > { %v2111_v28 = vmul.f32 %v2103_v26, %v2072_v37  ;;  %vm1935_vm10 = vcmp.ge.f32.partialorder %v5004_v57, 0.0  ;;  %v1915_v22 = vmul.f32 0.5, %v4812_v7  ;;  %v1919_v45 = vmul.f32 0.5, %v4982_v31  ;;  %v3550_v57 = vld [vmem:[%s807_s10] ss:$0 sm:$0xff] }
 0x90b   : > { %v2158_v18 = vmul.f32 %v2150_v32, %v5052_v21  ;;  %v3622_v52 = vpop.eup %3621  ;;  %v2226_v25 = vmul.f32 %v2218_v54, %v1914_v36  ;;  %v1943_v51 = vsel %vm1935_vm10, 1.0, %v4081_v2 }
 0x90c   : > { %v2119_v47 = vadd.f32 1.4214138, %v2111_v28  ;;  %v2195_v61 = vmul.f32 %v3622_v52, %v2155_v59 }
 0x90d   : > { %v2198_v34 = vmul.f32 %v3620_v3, %v2158_v18 }
 0x90e   : > { %v2127_v42 = vmul.f32 %v2119_v47, %v2072_v37  ;;  %v2203_v8 = vsub.f32 1.0, %v2195_v61 }
 0x90f   : > { %v2206_v62 = vsub.f32 1.0, %v2198_v34  ;;  %v3624_v60 = vpop.eup %3623 }
 0x910   : > { %v2135_v63 = vadd.f32 -0.28449672, %v2127_v42  ;;  %v2211_v15 = vmul.f32 %v2203_v8, %v1939_v29 }
 0x911   : > { %v2214_v21 = vmul.f32 %v2206_v62, %v1942_v0 }
 0x912   : > { %v2143_v48 = vmul.f32 %v2135_v63, %v2072_v37  ;;  %v2219_v5 = vadd.f32 1.0, %v2211_v15 }
 0x913   : > { %v2222_v49 = vadd.f32 1.0, %v2214_v21 }
 0x914   : > { %v2151_v53 = vadd.f32 0.2548296, %v2143_v48  ;;  %v2227_v1 = vmul.f32 %v2219_v5, %v1915_v22 }
 0x915   : > { %v2230_v10 = vmul.f32 %v2222_v49, %v1918_v24 }
 0x916   : > { %v2159_v13 = vmul.f32 %v2151_v53, %v2072_v37 }
 0x917   : > { %v2234_v23 = vpack.c.bf16 %v2230_v10, %v2226_v25 }
 0x918   : > { %v2199_v4 = vmul.f32 %v3624_v60, %v2159_v13 }
 0x919   : > { %2519 = vmatmul.bf16.vlgmr.msra.gmra.mxu2 %v2234_v23 }
 0x91a   : > { %v2207_v55 = vsub.f32 1.0, %v2199_v4 }
 0x91c   : > { %v2215_v12 = vmul.f32 %v2207_v55, %v1943_v51 }
 0x91e   : > { %v2223_v56 = vadd.f32 1.0, %v2215_v12 }
 0x920   : > { %v2231_v40 = vmul.f32 %v2223_v56, %v1919_v45 }
 0x922   : > { %v2235_v43 = vpack.c.bf16 %v2231_v40, %v2227_v1 }
 0x924   : > { %2533 = vmatmul.bf16.vlgmr.msra.gmra.mxu3 %v2235_v43 }
 0x980   : > { %v2506_v44 = vpop.f32.mrf.mxu1 }
 0x981   : > { %v2507_v41 = vadd.f32 %v3550_v57, %v2506_v44 }
 0x983   : > { %v2548_v7 = vpop.f32.mrf.mxu0 }
 0x988   : > { %v2508_v6 = vpop.f32.mrf.mxu1 }
 0x989   : > { %v2509_v50 = vadd.f32 %v3550_v57, %v2508_v6 }
 0x98b   : > { %v2550_v20 = vpop.f32.mrf.mxu0 }
 0x99c   : > { %v2520_v2 = vpop.f32.mrf.mxu2 }
 0x99d   : > { %v2521_v17 = vadd.f32 %v2520_v2, %v2507_v41 }
 0x9a4   : > { %v2522_v9 = vpop.f32.mrf.mxu2 }
 0x9a5   : > { %v2523_v30 = vadd.f32 %v2522_v9, %v2509_v50 }
 0x9a7   : > { %v2534_v31 = vpop.f32.mrf.mxu3 }
 0x9a8   : > { %v2535_v39 = vadd.f32 %v2534_v31, %v2521_v17 }
 0x9aa   : > { %v2549_v19 = vadd.f32 %v2548_v7, %v2535_v39 }
 0x9ac   : > { %v2553_v37 = vadd.f32 %v2549_v19, %v4690_v38 }
 0x9ae   : > { %2555 = vst [vmem:[%s4464_s9] sm:$0xff] %v2553_v37 }
 0x9af   : > { %v2536_v35 = vpop.f32.mrf.mxu3 }
 0x9b0   : > { %v2537_v14 = vadd.f32 %v2536_v35, %v2523_v30 }
 0x9b2   : > { %v2551_v58 = vadd.f32 %v2550_v20, %v2537_v14 }
 0x9b4   : > { %v2554_v32 = vadd.f32 %v2551_v58, %v4694_v46 }
 0x9b6   : > { %2556 = vst [vmem:[%s4464_s9 + $0x8] sm:$0xff] %v2554_v32 }
 0x9b7   : > { %3952 = shalt.err (!%p3949_p6)
}
 0x9b8   : > { %s4082_s15 = smov 128   ;;  %s4083_s9 = smov 8  }
 0x9b9   : > { %3403 = dma.vmem_to_hbm [thread:$0]  (%p4324_p12), %s2571_s28, 256, %s2573_s11, %s2558_s5, %s4082_s15, %s4082_s15, %s4083_s9  }
 0x9ba PF: > { %p3441_p8 = scmp.ge.s32.totalorder %s4067_s13, 2  ;;  %s2587_s20 = sand.u32 1, %s4039_s24  }
 0x9bb   : > { %s2588_s19 = scalar_lea.sflag [#allocation4], %s2587_s20 }
 0x9bc   : > { %p3437_p9 = pnand %p3441_p8, %p4333_p13 }
 0x9be   : > { %p3438_p2 = pneg %p3437_p9 }
 0x9c0   : > { %4022 = dma.done.wait (%p3438_p2), %s2588_s19, 256  }
 0x9c1   : > { %4024 = vsyncadd (%p3438_p2), %s2588_s19, 4294967040  ;;  %s43_s13 = sadd.s32 1, %s4067_s13   ;;  %s5258_s16 = sld [smem:[#allocation27_spill]] }
 0x9c2   : > { %p40_p4 = scmp.ge.s32.totalorder %s43_s13, 6   ;;  %s5259_s23 = sld [smem:[#allocation35_spill]] }
 0x9c3   : > { %s5260_s3 = sld [smem:[#allocation28_spill]]  ;;  %s5265_s21 = smov %s4031_s22 }
 0x9c4   : > { %s5261_s26 = sld [smem:[#allocation36_spill]]  ;;  %s5267_s24 = smov %s4043_s25 }
 0x9c5   : > { %s5262_s28 = sld [smem:[#allocation31_spill]]  ;;  %s5269_s27 = smov %s4059_s29 }
 0x9c6   : > { %s5263_s7 = sld [smem:[#allocation33_spill]] }
 0x9c7   : > { %s5264_s30 = sld [smem:[#allocation34_spill]]  ;;  %s5266_s22 = smov %s5258_s16 }
 0x9c8   :  { %42 = sbr.rel (!%p40_p4) target bundleno = 32 (0x20), region = 232 }
 0x9c9   : > { %s5268_s25 = smov %s5260_s3 }
 0x9cc   : > { %s5270_s29 = smov %s5263_s7 }
 0x9cd   :  { %2594 = vsyncpa [#allocation3], 1 }
 0x9ce   :  { %2596 = vsyncpa [#allocation3 + $0x1], 1 }
 0x9cf   :  { %2597 = vsyncpa [#allocation6], 1 }
 0x9d0   :  { %2599 = vsyncpa [#allocation6 + $0x1], 1 }
 0x9d1   :  { %2600 = vsyncpa [#allocation9], 1 }
 0x9d2   :  { %2602 = vsyncpa [#allocation9 + $0x1], 1 }
 0x9d3   :  { %2603 = vsyncpa [#allocation12], 1 }
 0x9d4   :  { %2605 = vsyncpa [#allocation12 + $0x1], 1 }
 0x9d5   :  { %2606 = vsyncpa [#allocation15], 1 }
 0x9d6   :  { %2608 = vsyncpa [#allocation15 + $0x1], 1 }
 0x9d7   :  { %2609 = vsyncpa [#allocation18], 1 }
 0x9d8   :  { %2611 = vsyncpa [#allocation18 + $0x1], 1 }
 0x9d9   :  { %2612 = vsyncpa [#allocation4], 1 }
 0x9da   :  { %2614 = vsyncpa [#allocation4 + $0x1], 1 }

</bundles_post_ra>
